<compile_context>
chip_gen: v7x
topology: tpu7x:2x2x1
jax: 0.10.0
libtpu: 0.0.40
codegen_flags: <defaults>
</compile_context>

<pallas_src>
import jax
import jax.numpy as jnp
from jax.experimental import pallas as pl
from jax.experimental.pallas import tpu as pltpu

EPS = 1e-5
LANE = 128
MXU_DTYPE = jnp.bfloat16      # MXU operand dtype; accumulation stays f32
NEG_BIG = -1e30               # bias for padded class lanes (vanishes in softmax)

NUM_CONV_LAYERS = 3
NUM_FC_LAYERS = 2


def _round_up(x, m):
    return ((x + m - 1) // m) * m


# ----------------------------------------------------------------------------
# In-kernel math helpers (all f32 elementwise; bf16 only at the MXU inputs).
# ----------------------------------------------------------------------------
def _bn_train(x, gamma, beta):
    # Folded training-mode BatchNorm1d: 2 VPU passes per element (mul + add).
    # var = E[x^2] - E[x]^2 (biased, torch train mode); the two axis-0
    # reductions are independent so they can overlap on the XLU.
    mean = jnp.mean(x, axis=0, keepdims=True)
    mean_sq = jnp.mean(x * x, axis=0, keepdims=True)
    var = mean_sq - mean * mean
    scale = gamma * jax.lax.rsqrt(var + EPS)
    shift = beta - mean * scale
    return x * scale + shift


def _prelu(v, a):
    return jnp.where(v >= 0, v, a * v)


def _mm(a, w):
    # bf16 x bf16 -> f32 accumulate on the MXU.
    return jnp.dot(a.astype(MXU_DTYPE), w, preferred_element_type=jnp.float32)


# ----------------------------------------------------------------------------
# Single fused kernel for the whole forward pass.
# ----------------------------------------------------------------------------
def fused_resmlp_kernel(
    batch_ref, x_ref,
    blk_bn_g_ref, blk_bn_b_ref,
    blk_w1ws_ref, blk_b1bs_ref,       # fused [w1 | linear_shortcut] per block
    blk_w2_ref, blk_b2_ref, blk_w3_ref, blk_b3_ref,
    fc_bn_g_ref, fc_bn_b_ref, fc_w_ref, fc_b_ref,
    bnh_g_ref, bnh_b_ref, cls_w_ref, cls_b_ref,
    alpha_ref,                        # SMEM (num_blocks*3,) f32
    out_ref,
):
    num_blocks = blk_w1ws_ref.shape[0]
    num_fc = fc_w_ref.shape[0]
    num_graphs = out_ref.shape[0]
    P = blk_w2_ref.shape[1]           # padded hidden width (128)

    # ---- node stage: [bn_feat + conv_feat], then 3x [bns_conv[i] + convs[i]]
    #      each: x_ = BN(x); x = relu(MLP(x_))   (no conv residual) ----
    h = x_ref[...]
    for i in range(num_blocks):
        xn = _bn_train(h, blk_bn_g_ref[i], blk_bn_b_ref[i])
        # One bf16 cast of xn, one 256-wide MXU matmul producing [fc1 | shortcut].
        ts = _mm(xn, blk_w1ws_ref[i]) + blk_b1bs_ref[i]          # (N, 2P)
        t = _prelu(ts[:, :P], alpha_ref[3 * i + 0])
        t = _prelu(_mm(t, blk_w2_ref[i]) + blk_b2_ref[i], alpha_ref[3 * i + 1])
        t = _prelu(_mm(t, blk_w3_ref[i]) + blk_b3_ref[i], alpha_ref[3 * i + 2])
        h = jnp.maximum(t + ts[:, P:], 0.0)                      # relu(fcs + shortcut)

    # ---- global_add_pool as a masked segment-sum: per graph, one lane-broadcast
    #      VPU multiply + one sublane (XLU) reduction.  No f32 MXU emulation,
    #      no (G, N) relayout. ----
    pooled = []
    for g in range(num_graphs):
        mask = (batch_ref[...] == g).astype(jnp.float32)         # (N, 1)
        pooled.append(jnp.sum(h * mask, axis=0, keepdims=True))  # (1, P)
    g_feat = jnp.concatenate(pooled, axis=0)                     # (G, P)

    # ---- fc layers: x_ = bns_fc[i](x); x = relu(lins[i](x_)) ----
    for i in range(num_fc):
        gn = _bn_train(g_feat, fc_bn_g_ref[i], fc_bn_b_ref[i])
        g_feat = jnp.maximum(_mm(gn, fc_w_ref[i]) + fc_b_ref[i], 0.0)

    # ---- bn_hidden -> lin_class -> log_softmax(dim=-1)  (dropout=0) ----
    gn = _bn_train(g_feat, bnh_g_ref[...], bnh_b_ref[...])
    y = _mm(gn, cls_w_ref[...]) + cls_b_ref[...]   # padded class lanes ~ -1e30
    m = jnp.max(y, axis=-1, keepdims=True)
    z = y - m
    lse = jnp.log(jnp.sum(jnp.exp(z), axis=-1, keepdims=True))
    out_ref[...] = z - lse


# ----------------------------------------------------------------------------
# Deterministic parameter construction (shapes from ResMLP.__init__).
# ----------------------------------------------------------------------------
def _linear_params(key, in_dim, out_dim):
    k1, k2 = jax.random.split(key)
    bound = 1.0 / jnp.sqrt(jnp.float32(in_dim))
    w = jax.random.uniform(k1, (in_dim, out_dim), jnp.float32, -bound, bound)
    b = jax.random.uniform(k2, (1, out_dim), jnp.float32, -bound, bound)
    return w, b


def _bn_params(dim):
    # torch.nn.init.constant_(weight, 1); constant_(bias, 0.0001)
    return jnp.ones((1, dim), jnp.float32), jnp.full((1, dim), 1e-4, jnp.float32)


def _mlp_params(key, in_dim, out_dim):
    ks = jax.random.split(key, 4)
    w1, b1 = _linear_params(ks[0], in_dim, out_dim)
    w2, b2 = _linear_params(ks[1], out_dim, out_dim)
    w3, b3 = _linear_params(ks[2], out_dim, out_dim)
    ws, bs = _linear_params(ks[3], in_dim, out_dim)
    alphas = jnp.full((3,), 0.25, jnp.float32)   # PReLU default init, one per PReLU
    return dict(w1=w1, b1=b1, w2=w2, b2=b2, w3=w3, b3=b3, ws=ws, bs=bs,
                alphas=alphas)


def make_params(key, num_features, hidden, num_classes,
                num_conv_layers=NUM_CONV_LAYERS, num_fc_layers=NUM_FC_LAYERS):
    keys = jax.random.split(key, 2 + num_conv_layers + num_fc_layers)
    params = {}
    params["bn_feat"] = _bn_params(num_features)
    params["conv_feat"] = _mlp_params(keys[0], num_features, hidden)
    params["convs"] = []
    for i in range(num_conv_layers):
        params["convs"].append(
            (_bn_params(hidden), _mlp_params(keys[1 + i], hidden, hidden)))
    params["fcs"] = []
    for i in range(num_fc_layers - 1):
        params["fcs"].append(
            (_bn_params(hidden),
             _linear_params(keys[1 + num_conv_layers + i], hidden, hidden)))
    params["bn_hidden"] = _bn_params(hidden)
    params["lin_class"] = _linear_params(keys[-1], hidden, num_classes)
    return params


# ----------------------------------------------------------------------------
# Pack params into the fused-kernel layout: pad all feature/hidden/class dims
# to 128 lanes, stack the 4 node blocks, fuse [w1 | shortcut] weights, store
# matmul weights in bf16.
# ----------------------------------------------------------------------------
def _pad2(a, rows, cols):
    return jnp.pad(a, ((0, rows - a.shape[0]), (0, cols - a.shape[1])))


def pack_params(params, num_features, hidden, num_classes):
    P = _round_up(max(num_features, hidden), LANE)
    Cp = _round_up(num_classes, LANE)

    def pad_w(w):                      # (in, out) -> (P, P) bf16
        return _pad2(w, P, P).astype(MXU_DTYPE)

    def pad_row(v):                    # (1, d) -> (1, P) f32
        return _pad2(v, 1, P)

    # Node blocks: [bn_feat + conv_feat] followed by (bns_conv[i], convs[i]).
    blocks = [(params["bn_feat"], params["conv_feat"])] + list(params["convs"])
    packed = dict(
        blk_bn_g=jnp.stack([pad_row(bn[0]) for bn, _ in blocks]),
        blk_bn_b=jnp.stack([pad_row(bn[1]) for bn, _ in blocks]),
        # Fused [w1 | ws]: (B, P, 2P) bf16 ; [b1 | bs]: (B, 1, 2P) f32.
        blk_w1ws=jnp.stack(
            [jnp.concatenate([pad_w(m["w1"]), pad_w(m["ws"])], axis=1)
             for _, m in blocks]),
        blk_b1bs=jnp.stack(
            [jnp.concatenate([pad_row(m["b1"]), pad_row(m["bs"])], axis=1)
             for _, m in blocks]),
        blk_w2=jnp.stack([pad_w(m["w2"]) for _, m in blocks]),
        blk_b2=jnp.stack([pad_row(m["b2"]) for _, m in blocks]),
        blk_w3=jnp.stack([pad_w(m["w3"]) for _, m in blocks]),
        blk_b3=jnp.stack([pad_row(m["b3"]) for _, m in blocks]),
        alphas=jnp.concatenate([m["alphas"].reshape(-1) for _, m in blocks]),
    )

    # fc stage (num_fc_layers - 1 layers, stacked).
    packed["fc_bn_g"] = jnp.stack([pad_row(g) for (g, _b), _ in params["fcs"]])
    packed["fc_bn_b"] = jnp.stack([pad_row(b) for (_g, b), _ in params["fcs"]])
    packed["fc_w"] = jnp.stack([pad_w(w) for _, (w, _b) in params["fcs"]])
    packed["fc_b"] = jnp.stack([pad_row(b) for _, (_w, b) in params["fcs"]])

    packed["bnh_g"] = pad_row(params["bn_hidden"][0])
    packed["bnh_b"] = pad_row(params["bn_hidden"][1])

    cls_w, cls_b = params["lin_class"]
    packed["cls_w"] = _pad2(cls_w, P, Cp).astype(MXU_DTYPE)
    packed["cls_b"] = jnp.full((1, Cp), NEG_BIG, jnp.float32).at[:, :num_classes].set(cls_b)

    packed["P"] = P
    packed["Cp"] = Cp
    return packed


# ----------------------------------------------------------------------------
# Per-generation VMEM budget (v7x has 64 MiB/TC; v5e/v6e 128 MiB).
# ----------------------------------------------------------------------------
def _vmem_limit_bytes():
    cap = 64 * 1024 * 1024            # conservative default (v7x per-TC VMEM)
    try:
        info = pltpu.get_tpu_info()
        cap = int(getattr(info, "vmem_capacity_bytes", cap))
    except Exception:
        pass
    # Leave headroom for compiler-internal scratch / output writeback buffers.
    return max(16 * 1024 * 1024, min(cap - 16 * 1024 * 1024, 100 * 1024 * 1024))


# ----------------------------------------------------------------------------
# Forward wrapper: one pallas_call for the whole network.
# ----------------------------------------------------------------------------
def res_mlp_forward(x, batch_ids, packed, num_graphs, num_classes):
    n_nodes = x.shape[0]
    P, Cp = packed["P"], packed["Cp"]

    x_p = _pad2(x, n_nodes, P)                                   # pad feature lanes
    batch_col = batch_ids.reshape(n_nodes, 1).astype(jnp.int32)  # (N, 1) for pooling

    vmem = pl.BlockSpec(memory_space=pltpu.MemorySpace.VMEM)
    smem = pl.BlockSpec(memory_space=pltpu.MemorySpace.SMEM)

    args = (
        batch_col, x_p,
        packed["blk_bn_g"], packed["blk_bn_b"],
        packed["blk_w1ws"], packed["blk_b1bs"],
        packed["blk_w2"], packed["blk_b2"],
        packed["blk_w3"], packed["blk_b3"],
        packed["fc_bn_g"], packed["fc_bn_b"],
        packed["fc_w"], packed["fc_b"],
        packed["bnh_g"], packed["bnh_b"],
        packed["cls_w"], packed["cls_b"],
        packed["alphas"],
    )
    in_specs = [vmem] * (len(args) - 1) + [smem]   # alphas ride SMEM scalars

    out_padded = pl.pallas_call(
        fused_resmlp_kernel,
        out_shape=jax.ShapeDtypeStruct((num_graphs, Cp), jnp.float32),
        in_specs=in_specs,
        out_specs=vmem,
        compiler_params=pltpu.CompilerParams(
            vmem_limit_bytes=_vmem_limit_bytes()),
    )(*args)

    return out_padded[:, :num_classes]


# ----------------------------------------------------------------------------
if __name__ == "__main__":
    key = jax.random.PRNGKey(0)
    k_x, k_p = jax.random.split(key)

    NUM_FEATURES = 8     # dataset.num_features
    HIDDEN = 32
    NUM_CLASSES = 4      # dataset.num_classes
    NUM_NODES = 16       # total nodes across the mini-batch of graphs
    NUM_GRAPHS = 2

    x = jax.random.normal(k_x, (NUM_NODES, NUM_FEATURES), jnp.float32)
    # irregular graph sizes: 10 nodes in graph 0, 6 nodes in graph 1
    batch_ids = jnp.concatenate(
        [jnp.zeros((10,), jnp.int32), jnp.ones((6,), jnp.int32)])

    params = make_params(k_p, NUM_FEATURES, HIDDEN, NUM_CLASSES)
    packed = pack_params(params, NUM_FEATURES, HIDDEN, NUM_CLASSES)

    out = res_mlp_forward(x, batch_ids, packed, NUM_GRAPHS, NUM_CLASSES)
    out = jax.block_until_ready(out)

    assert out.shape == (NUM_GRAPHS, NUM_CLASSES)
    assert bool(jnp.all(jnp.isfinite(out)))
    # rows of log_softmax must exp-sum to 1
    assert jnp.allclose(jnp.sum(jnp.exp(out), axis=-1), 1.0, atol=1e-5)
    print("KERNEL_OK")
</pallas_src>

<mosaic_0001>
module attributes {stable_mosaic.version = 11 : i64} {
  func.func @fused_resmlp_kernel(%arg0: memref<16x1xi32, #tpu.memory_space<vmem>>, %arg1: memref<16x128xf32, #tpu.memory_space<vmem>>, %arg2: memref<4x1x128xf32, #tpu.memory_space<vmem>>, %arg3: memref<4x1x128xf32, #tpu.memory_space<vmem>>, %arg4: memref<4x128x256xbf16, #tpu.memory_space<vmem>>, %arg5: memref<4x1x256xf32, #tpu.memory_space<vmem>>, %arg6: memref<4x128x128xbf16, #tpu.memory_space<vmem>>, %arg7: memref<4x1x128xf32, #tpu.memory_space<vmem>>, %arg8: memref<4x128x128xbf16, #tpu.memory_space<vmem>>, %arg9: memref<4x1x128xf32, #tpu.memory_space<vmem>>, %arg10: memref<1x1x128xf32, #tpu.memory_space<vmem>>, %arg11: memref<1x1x128xf32, #tpu.memory_space<vmem>>, %arg12: memref<1x128x128xbf16, #tpu.memory_space<vmem>>, %arg13: memref<1x1x128xf32, #tpu.memory_space<vmem>>, %arg14: memref<1x128xf32, #tpu.memory_space<vmem>>, %arg15: memref<1x128xf32, #tpu.memory_space<vmem>>, %arg16: memref<128x128xbf16, #tpu.memory_space<vmem>>, %arg17: memref<1x128xf32, #tpu.memory_space<vmem>>, %arg18: memref<12xf32, #tpu.memory_space<smem>>, %arg19: memref<2x128xf32, #tpu.memory_space<vmem>>) attributes {dimension_semantics = [], scalar_prefetch = 0 : i64, scratch_operands = 0 : i64, tpu.core_type = #tpu.core_type<tc>} {
    %c0 = arith.constant 0 : index
    %c0_0 = arith.constant 0 : index
    %0 = vector.load %arg1[%c0, %c0_0] : memref<16x128xf32, #tpu.memory_space<vmem>>, vector<16x128xf32>
    %c0_1 = arith.constant 0 : index
    %c0_2 = arith.constant 0 : index
    %c0_3 = arith.constant 0 : index
    %1 = vector.load %arg2[%c0_1, %c0_2, %c0_3] : memref<4x1x128xf32, #tpu.memory_space<vmem>>, vector<1x1x128xf32>
    %2 = vector.shape_cast %1 : vector<1x1x128xf32> to vector<1x128xf32>
    %c0_4 = arith.constant 0 : index
    %c0_5 = arith.constant 0 : index
    %c0_6 = arith.constant 0 : index
    %3 = vector.load %arg3[%c0_4, %c0_5, %c0_6] : memref<4x1x128xf32, #tpu.memory_space<vmem>>, vector<1x1x128xf32>
    %4 = vector.shape_cast %3 : vector<1x1x128xf32> to vector<1x128xf32>
    %cst = arith.constant dense<0.000000e+00> : vector<128xf32>
    %5 = vector.multi_reduction <add>, %0, %cst [0] : vector<16x128xf32> to vector<128xf32>
    %6 = vector.shape_cast %5 : vector<128xf32> to vector<1x128xf32>
    %cst_7 = arith.constant 1.600000e+01 : f32
    %7 = vector.broadcast %cst_7 : f32 to vector<1x128xf32>
    %8 = arith.divf %6, %7 : vector<1x128xf32>
    %9 = arith.mulf %0, %0 : vector<16x128xf32>
    %cst_8 = arith.constant dense<0.000000e+00> : vector<128xf32>
    %10 = vector.multi_reduction <add>, %9, %cst_8 [0] : vector<16x128xf32> to vector<128xf32>
    %11 = vector.shape_cast %10 : vector<128xf32> to vector<1x128xf32>
    %cst_9 = arith.constant 1.600000e+01 : f32
    %12 = vector.broadcast %cst_9 : f32 to vector<1x128xf32>
    %13 = arith.divf %11, %12 : vector<1x128xf32>
    %14 = arith.mulf %8, %8 : vector<1x128xf32>
    %15 = arith.subf %13, %14 : vector<1x128xf32>
    %cst_10 = arith.constant 9.99999974E-6 : f32
    %16 = vector.broadcast %cst_10 : f32 to vector<1x128xf32>
    %17 = arith.addf %15, %16 : vector<1x128xf32>
    %18 = math.rsqrt %17 : vector<1x128xf32>
    %19 = arith.mulf %2, %18 : vector<1x128xf32>
    %20 = arith.mulf %8, %19 : vector<1x128xf32>
    %21 = arith.subf %4, %20 : vector<1x128xf32>
    %22 = vector.broadcast %19 : vector<1x128xf32> to vector<16x128xf32>
    %23 = arith.mulf %0, %22 : vector<16x128xf32>
    %24 = vector.broadcast %21 : vector<1x128xf32> to vector<16x128xf32>
    %25 = arith.addf %23, %24 : vector<16x128xf32>
    %c0_11 = arith.constant 0 : index
    %c0_12 = arith.constant 0 : index
    %c0_13 = arith.constant 0 : index
    %26 = vector.load %arg4[%c0_11, %c0_12, %c0_13] : memref<4x128x256xbf16, #tpu.memory_space<vmem>>, vector<1x128x256xbf16>
    %27 = vector.shape_cast %26 : vector<1x128x256xbf16> to vector<128x256xbf16>
    %28 = arith.truncf %25 : vector<16x128xf32> to vector<16x128xbf16>
    %cst_14 = arith.constant dense<0.000000e+00> : vector<16x256xf32>
    %29 = tpu.matmul %28, %27, %cst_14 {dimension_numbers = #tpu.dot_dimension_numbers<[1], [0], [0], [1], [0, 0, 1, 1], [], []>} : vector<16x128xbf16>, vector<128x256xbf16>, vector<16x256xf32> -> vector<16x256xf32>
    %c0_15 = arith.constant 0 : index
    %c0_16 = arith.constant 0 : index
    %c0_17 = arith.constant 0 : index
    %30 = vector.load %arg5[%c0_15, %c0_16, %c0_17] : memref<4x1x256xf32, #tpu.memory_space<vmem>>, vector<1x1x256xf32>
    %31 = vector.shape_cast %30 : vector<1x1x256xf32> to vector<1x256xf32>
    %32 = vector.broadcast %31 : vector<1x256xf32> to vector<16x256xf32>
    %33 = arith.addf %29, %32 : vector<16x256xf32>
    %34 = vector.extract_strided_slice %33 {offsets = [0, 0], sizes = [16, 128], strides = [1, 1]} : vector<16x256xf32> to vector<16x128xf32>
    %c0_18 = arith.constant 0 : index
    %35 = memref.load %arg18[%c0_18] : memref<12xf32, #tpu.memory_space<smem>>
    %cst_19 = arith.constant 0.000000e+00 : f32
    %36 = vector.broadcast %cst_19 : f32 to vector<16x128xf32>
    %37 = arith.cmpf oge, %34, %36 : vector<16x128xf32>
    %38 = vector.broadcast %35 : f32 to vector<16x128xf32>
    %39 = arith.mulf %38, %34 : vector<16x128xf32>
    %40 = arith.select %37, %34, %39 : vector<16x128xi1>, vector<16x128xf32>
    %c0_20 = arith.constant 0 : index
    %c0_21 = arith.constant 0 : index
    %c0_22 = arith.constant 0 : index
    %41 = vector.load %arg6[%c0_20, %c0_21, %c0_22] : memref<4x128x128xbf16, #tpu.memory_space<vmem>>, vector<1x128x128xbf16>
    %42 = vector.shape_cast %41 : vector<1x128x128xbf16> to vector<128x128xbf16>
    %43 = arith.truncf %40 : vector<16x128xf32> to vector<16x128xbf16>
    %cst_23 = arith.constant dense<0.000000e+00> : vector<16x128xf32>
    %44 = tpu.matmul %43, %42, %cst_23 {dimension_numbers = #tpu.dot_dimension_numbers<[1], [0], [0], [1], [0, 0, 1, 1], [], []>} : vector<16x128xbf16>, vector<128x128xbf16>, vector<16x128xf32> -> vector<16x128xf32>
    %c0_24 = arith.constant 0 : index
    %c0_25 = arith.constant 0 : index
    %c0_26 = arith.constant 0 : index
    %45 = vector.load %arg7[%c0_24, %c0_25, %c0_26] : memref<4x1x128xf32, #tpu.memory_space<vmem>>, vector<1x1x128xf32>
    %46 = vector.shape_cast %45 : vector<1x1x128xf32> to vector<1x128xf32>
    %47 = vector.broadcast %46 : vector<1x128xf32> to vector<16x128xf32>
    %48 = arith.addf %44, %47 : vector<16x128xf32>
    %c1 = arith.constant 1 : index
    %49 = memref.load %arg18[%c1] : memref<12xf32, #tpu.memory_space<smem>>
    %cst_27 = arith.constant 0.000000e+00 : f32
    %50 = vector.broadcast %cst_27 : f32 to vector<16x128xf32>
    %51 = arith.cmpf oge, %48, %50 : vector<16x128xf32>
    %52 = vector.broadcast %49 : f32 to vector<16x128xf32>
    %53 = arith.mulf %52, %48 : vector<16x128xf32>
    %54 = arith.select %51, %48, %53 : vector<16x128xi1>, vector<16x128xf32>
    %c0_28 = arith.constant 0 : index
    %c0_29 = arith.constant 0 : index
    %c0_30 = arith.constant 0 : index
    %55 = vector.load %arg8[%c0_28, %c0_29, %c0_30] : memref<4x128x128xbf16, #tpu.memory_space<vmem>>, vector<1x128x128xbf16>
    %56 = vector.shape_cast %55 : vector<1x128x128xbf16> to vector<128x128xbf16>
    %57 = arith.truncf %54 : vector<16x128xf32> to vector<16x128xbf16>
    %cst_31 = arith.constant dense<0.000000e+00> : vector<16x128xf32>
    %58 = tpu.matmul %57, %56, %cst_31 {dimension_numbers = #tpu.dot_dimension_numbers<[1], [0], [0], [1], [0, 0, 1, 1], [], []>} : vector<16x128xbf16>, vector<128x128xbf16>, vector<16x128xf32> -> vector<16x128xf32>
    %c0_32 = arith.constant 0 : index
    %c0_33 = arith.constant 0 : index
    %c0_34 = arith.constant 0 : index
    %59 = vector.load %arg9[%c0_32, %c0_33, %c0_34] : memref<4x1x128xf32, #tpu.memory_space<vmem>>, vector<1x1x128xf32>
    %60 = vector.shape_cast %59 : vector<1x1x128xf32> to vector<1x128xf32>
    %61 = vector.broadcast %60 : vector<1x128xf32> to vector<16x128xf32>
    %62 = arith.addf %58, %61 : vector<16x128xf32>
    %c2 = arith.constant 2 : index
    %63 = memref.load %arg18[%c2] : memref<12xf32, #tpu.memory_space<smem>>
    %cst_35 = arith.constant 0.000000e+00 : f32
    %64 = vector.broadcast %cst_35 : f32 to vector<16x128xf32>
    %65 = arith.cmpf oge, %62, %64 : vector<16x128xf32>
    %66 = vector.broadcast %63 : f32 to vector<16x128xf32>
    %67 = arith.mulf %66, %62 : vector<16x128xf32>
    %68 = arith.select %65, %62, %67 : vector<16x128xi1>, vector<16x128xf32>
    %69 = vector.extract_strided_slice %33 {offsets = [0, 128], sizes = [16, 128], strides = [1, 1]} : vector<16x256xf32> to vector<16x128xf32>
    %70 = arith.addf %68, %69 : vector<16x128xf32>
    %cst_36 = arith.constant 0.000000e+00 : f32
    %71 = vector.broadcast %cst_36 : f32 to vector<16x128xf32>
    %72 = arith.maximumf %70, %71 : vector<16x128xf32>
    %c1_37 = arith.constant 1 : index
    %c0_38 = arith.constant 0 : index
    %c0_39 = arith.constant 0 : index
    %73 = vector.load %arg2[%c1_37, %c0_38, %c0_39] : memref<4x1x128xf32, #tpu.memory_space<vmem>>, vector<1x1x128xf32>
    %74 = vector.shape_cast %73 : vector<1x1x128xf32> to vector<1x128xf32>
    %c1_40 = arith.constant 1 : index
    %c0_41 = arith.constant 0 : index
    %c0_42 = arith.constant 0 : index
    %75 = vector.load %arg3[%c1_40, %c0_41, %c0_42] : memref<4x1x128xf32, #tpu.memory_space<vmem>>, vector<1x1x128xf32>
    %76 = vector.shape_cast %75 : vector<1x1x128xf32> to vector<1x128xf32>
    %cst_43 = arith.constant dense<0.000000e+00> : vector<128xf32>
    %77 = vector.multi_reduction <add>, %72, %cst_43 [0] : vector<16x128xf32> to vector<128xf32>
    %78 = vector.shape_cast %77 : vector<128xf32> to vector<1x128xf32>
    %cst_44 = arith.constant 1.600000e+01 : f32
    %79 = vector.broadcast %cst_44 : f32 to vector<1x128xf32>
    %80 = arith.divf %78, %79 : vector<1x128xf32>
    %81 = arith.mulf %72, %72 : vector<16x128xf32>
    %cst_45 = arith.constant dense<0.000000e+00> : vector<128xf32>
    %82 = vector.multi_reduction <add>, %81, %cst_45 [0] : vector<16x128xf32> to vector<128xf32>
    %83 = vector.shape_cast %82 : vector<128xf32> to vector<1x128xf32>
    %cst_46 = arith.constant 1.600000e+01 : f32
    %84 = vector.broadcast %cst_46 : f32 to vector<1x128xf32>
    %85 = arith.divf %83, %84 : vector<1x128xf32>
    %86 = arith.mulf %80, %80 : vector<1x128xf32>
    %87 = arith.subf %85, %86 : vector<1x128xf32>
    %cst_47 = arith.constant 9.99999974E-6 : f32
    %88 = vector.broadcast %cst_47 : f32 to vector<1x128xf32>
    %89 = arith.addf %87, %88 : vector<1x128xf32>
    %90 = math.rsqrt %89 : vector<1x128xf32>
    %91 = arith.mulf %74, %90 : vector<1x128xf32>
    %92 = arith.mulf %80, %91 : vector<1x128xf32>
    %93 = arith.subf %76, %92 : vector<1x128xf32>
    %94 = vector.broadcast %91 : vector<1x128xf32> to vector<16x128xf32>
    %95 = arith.mulf %72, %94 : vector<16x128xf32>
    %96 = vector.broadcast %93 : vector<1x128xf32> to vector<16x128xf32>
    %97 = arith.addf %95, %96 : vector<16x128xf32>
    %c1_48 = arith.constant 1 : index
    %c0_49 = arith.constant 0 : index
    %c0_50 = arith.constant 0 : index
    %98 = vector.load %arg4[%c1_48, %c0_49, %c0_50] : memref<4x128x256xbf16, #tpu.memory_space<vmem>>, vector<1x128x256xbf16>
    %99 = vector.shape_cast %98 : vector<1x128x256xbf16> to vector<128x256xbf16>
    %100 = arith.truncf %97 : vector<16x128xf32> to vector<16x128xbf16>
    %cst_51 = arith.constant dense<0.000000e+00> : vector<16x256xf32>
    %101 = tpu.matmul %100, %99, %cst_51 {dimension_numbers = #tpu.dot_dimension_numbers<[1], [0], [0], [1], [0, 0, 1, 1], [], []>} : vector<16x128xbf16>, vector<128x256xbf16>, vector<16x256xf32> -> vector<16x256xf32>
    %c1_52 = arith.constant 1 : index
    %c0_53 = arith.constant 0 : index
    %c0_54 = arith.constant 0 : index
    %102 = vector.load %arg5[%c1_52, %c0_53, %c0_54] : memref<4x1x256xf32, #tpu.memory_space<vmem>>, vector<1x1x256xf32>
    %103 = vector.shape_cast %102 : vector<1x1x256xf32> to vector<1x256xf32>
    %104 = vector.broadcast %103 : vector<1x256xf32> to vector<16x256xf32>
    %105 = arith.addf %101, %104 : vector<16x256xf32>
    %106 = vector.extract_strided_slice %105 {offsets = [0, 0], sizes = [16, 128], strides = [1, 1]} : vector<16x256xf32> to vector<16x128xf32>
    %c3 = arith.constant 3 : index
    %107 = memref.load %arg18[%c3] : memref<12xf32, #tpu.memory_space<smem>>
    %cst_55 = arith.constant 0.000000e+00 : f32
    %108 = vector.broadcast %cst_55 : f32 to vector<16x128xf32>
    %109 = arith.cmpf oge, %106, %108 : vector<16x128xf32>
    %110 = vector.broadcast %107 : f32 to vector<16x128xf32>
    %111 = arith.mulf %110, %106 : vector<16x128xf32>
    %112 = arith.select %109, %106, %111 : vector<16x128xi1>, vector<16x128xf32>
    %c1_56 = arith.constant 1 : index
    %c0_57 = arith.constant 0 : index
    %c0_58 = arith.constant 0 : index
    %113 = vector.load %arg6[%c1_56, %c0_57, %c0_58] : memref<4x128x128xbf16, #tpu.memory_space<vmem>>, vector<1x128x128xbf16>
    %114 = vector.shape_cast %113 : vector<1x128x128xbf16> to vector<128x128xbf16>
    %115 = arith.truncf %112 : vector<16x128xf32> to vector<16x128xbf16>
    %cst_59 = arith.constant dense<0.000000e+00> : vector<16x128xf32>
    %116 = tpu.matmul %115, %114, %cst_59 {dimension_numbers = #tpu.dot_dimension_numbers<[1], [0], [0], [1], [0, 0, 1, 1], [], []>} : vector<16x128xbf16>, vector<128x128xbf16>, vector<16x128xf32> -> vector<16x128xf32>
    %c1_60 = arith.constant 1 : index
    %c0_61 = arith.constant 0 : index
    %c0_62 = arith.constant 0 : index
    %117 = vector.load %arg7[%c1_60, %c0_61, %c0_62] : memref<4x1x128xf32, #tpu.memory_space<vmem>>, vector<1x1x128xf32>
    %118 = vector.shape_cast %117 : vector<1x1x128xf32> to vector<1x128xf32>
    %119 = vector.broadcast %118 : vector<1x128xf32> to vector<16x128xf32>
    %120 = arith.addf %116, %119 : vector<16x128xf32>
    %c4 = arith.constant 4 : index
    %121 = memref.load %arg18[%c4] : memref<12xf32, #tpu.memory_space<smem>>
    %cst_63 = arith.constant 0.000000e+00 : f32
    %122 = vector.broadcast %cst_63 : f32 to vector<16x128xf32>
    %123 = arith.cmpf oge, %120, %122 : vector<16x128xf32>
    %124 = vector.broadcast %121 : f32 to vector<16x128xf32>
    %125 = arith.mulf %124, %120 : vector<16x128xf32>
    %126 = arith.select %123, %120, %125 : vector<16x128xi1>, vector<16x128xf32>
    %c1_64 = arith.constant 1 : index
    %c0_65 = arith.constant 0 : index
    %c0_66 = arith.constant 0 : index
    %127 = vector.load %arg8[%c1_64, %c0_65, %c0_66] : memref<4x128x128xbf16, #tpu.memory_space<vmem>>, vector<1x128x128xbf16>
    %128 = vector.shape_cast %127 : vector<1x128x128xbf16> to vector<128x128xbf16>
    %129 = arith.truncf %126 : vector<16x128xf32> to vector<16x128xbf16>
    %cst_67 = arith.constant dense<0.000000e+00> : vector<16x128xf32>
    %130 = tpu.matmul %129, %128, %cst_67 {dimension_numbers = #tpu.dot_dimension_numbers<[1], [0], [0], [1], [0, 0, 1, 1], [], []>} : vector<16x128xbf16>, vector<128x128xbf16>, vector<16x128xf32> -> vector<16x128xf32>
    %c1_68 = arith.constant 1 : index
    %c0_69 = arith.constant 0 : index
    %c0_70 = arith.constant 0 : index
    %131 = vector.load %arg9[%c1_68, %c0_69, %c0_70] : memref<4x1x128xf32, #tpu.memory_space<vmem>>, vector<1x1x128xf32>
    %132 = vector.shape_cast %131 : vector<1x1x128xf32> to vector<1x128xf32>
    %133 = vector.broadcast %132 : vector<1x128xf32> to vector<16x128xf32>
    %134 = arith.addf %130, %133 : vector<16x128xf32>
    %c5 = arith.constant 5 : index
    %135 = memref.load %arg18[%c5] : memref<12xf32, #tpu.memory_space<smem>>
    %cst_71 = arith.constant 0.000000e+00 : f32
    %136 = vector.broadcast %cst_71 : f32 to vector<16x128xf32>
    %137 = arith.cmpf oge, %134, %136 : vector<16x128xf32>
    %138 = vector.broadcast %135 : f32 to vector<16x128xf32>
    %139 = arith.mulf %138, %134 : vector<16x128xf32>
    %140 = arith.select %137, %134, %139 : vector<16x128xi1>, vector<16x128xf32>
    %141 = vector.extract_strided_slice %105 {offsets = [0, 128], sizes = [16, 128], strides = [1, 1]} : vector<16x256xf32> to vector<16x128xf32>
    %142 = arith.addf %140, %141 : vector<16x128xf32>
    %cst_72 = arith.constant 0.000000e+00 : f32
    %143 = vector.broadcast %cst_72 : f32 to vector<16x128xf32>
    %144 = arith.maximumf %142, %143 : vector<16x128xf32>
    %c2_73 = arith.constant 2 : index
    %c0_74 = arith.constant 0 : index
    %c0_75 = arith.constant 0 : index
    %145 = vector.load %arg2[%c2_73, %c0_74, %c0_75] : memref<4x1x128xf32, #tpu.memory_space<vmem>>, vector<1x1x128xf32>
    %146 = vector.shape_cast %145 : vector<1x1x128xf32> to vector<1x128xf32>
    %c2_76 = arith.constant 2 : index
    %c0_77 = arith.constant 0 : index
    %c0_78 = arith.constant 0 : index
    %147 = vector.load %arg3[%c2_76, %c0_77, %c0_78] : memref<4x1x128xf32, #tpu.memory_space<vmem>>, vector<1x1x128xf32>
    %148 = vector.shape_cast %147 : vector<1x1x128xf32> to vector<1x128xf32>
    %cst_79 = arith.constant dense<0.000000e+00> : vector<128xf32>
    %149 = vector.multi_reduction <add>, %144, %cst_79 [0] : vector<16x128xf32> to vector<128xf32>
    %150 = vector.shape_cast %149 : vector<128xf32> to vector<1x128xf32>
    %cst_80 = arith.constant 1.600000e+01 : f32
    %151 = vector.broadcast %cst_80 : f32 to vector<1x128xf32>
    %152 = arith.divf %150, %151 : vector<1x128xf32>
    %153 = arith.mulf %144, %144 : vector<16x128xf32>
    %cst_81 = arith.constant dense<0.000000e+00> : vector<128xf32>
    %154 = vector.multi_reduction <add>, %153, %cst_81 [0] : vector<16x128xf32> to vector<128xf32>
    %155 = vector.shape_cast %154 : vector<128xf32> to vector<1x128xf32>
    %cst_82 = arith.constant 1.600000e+01 : f32
    %156 = vector.broadcast %cst_82 : f32 to vector<1x128xf32>
    %157 = arith.divf %155, %156 : vector<1x128xf32>
    %158 = arith.mulf %152, %152 : vector<1x128xf32>
    %159 = arith.subf %157, %158 : vector<1x128xf32>
    %cst_83 = arith.constant 9.99999974E-6 : f32
    %160 = vector.broadcast %cst_83 : f32 to vector<1x128xf32>
    %161 = arith.addf %159, %160 : vector<1x128xf32>
    %162 = math.rsqrt %161 : vector<1x128xf32>
    %163 = arith.mulf %146, %162 : vector<1x128xf32>
    %164 = arith.mulf %152, %163 : vector<1x128xf32>
    %165 = arith.subf %148, %164 : vector<1x128xf32>
    %166 = vector.broadcast %163 : vector<1x128xf32> to vector<16x128xf32>
    %167 = arith.mulf %144, %166 : vector<16x128xf32>
    %168 = vector.broadcast %165 : vector<1x128xf32> to vector<16x128xf32>
    %169 = arith.addf %167, %168 : vector<16x128xf32>
    %c2_84 = arith.constant 2 : index
    %c0_85 = arith.constant 0 : index
    %c0_86 = arith.constant 0 : index
    %170 = vector.load %arg4[%c2_84, %c0_85, %c0_86] : memref<4x128x256xbf16, #tpu.memory_space<vmem>>, vector<1x128x256xbf16>
    %171 = vector.shape_cast %170 : vector<1x128x256xbf16> to vector<128x256xbf16>
    %172 = arith.truncf %169 : vector<16x128xf32> to vector<16x128xbf16>
    %cst_87 = arith.constant dense<0.000000e+00> : vector<16x256xf32>
    %173 = tpu.matmul %172, %171, %cst_87 {dimension_numbers = #tpu.dot_dimension_numbers<[1], [0], [0], [1], [0, 0, 1, 1], [], []>} : vector<16x128xbf16>, vector<128x256xbf16>, vector<16x256xf32> -> vector<16x256xf32>
    %c2_88 = arith.constant 2 : index
    %c0_89 = arith.constant 0 : index
    %c0_90 = arith.constant 0 : index
    %174 = vector.load %arg5[%c2_88, %c0_89, %c0_90] : memref<4x1x256xf32, #tpu.memory_space<vmem>>, vector<1x1x256xf32>
    %175 = vector.shape_cast %174 : vector<1x1x256xf32> to vector<1x256xf32>
    %176 = vector.broadcast %175 : vector<1x256xf32> to vector<16x256xf32>
    %177 = arith.addf %173, %176 : vector<16x256xf32>
    %178 = vector.extract_strided_slice %177 {offsets = [0, 0], sizes = [16, 128], strides = [1, 1]} : vector<16x256xf32> to vector<16x128xf32>
    %c6 = arith.constant 6 : index
    %179 = memref.load %arg18[%c6] : memref<12xf32, #tpu.memory_space<smem>>
    %cst_91 = arith.constant 0.000000e+00 : f32
    %180 = vector.broadcast %cst_91 : f32 to vector<16x128xf32>
    %181 = arith.cmpf oge, %178, %180 : vector<16x128xf32>
    %182 = vector.broadcast %179 : f32 to vector<16x128xf32>
    %183 = arith.mulf %182, %178 : vector<16x128xf32>
    %184 = arith.select %181, %178, %183 : vector<16x128xi1>, vector<16x128xf32>
    %c2_92 = arith.constant 2 : index
    %c0_93 = arith.constant 0 : index
    %c0_94 = arith.constant 0 : index
    %185 = vector.load %arg6[%c2_92, %c0_93, %c0_94] : memref<4x128x128xbf16, #tpu.memory_space<vmem>>, vector<1x128x128xbf16>
    %186 = vector.shape_cast %185 : vector<1x128x128xbf16> to vector<128x128xbf16>
    %187 = arith.truncf %184 : vector<16x128xf32> to vector<16x128xbf16>
    %cst_95 = arith.constant dense<0.000000e+00> : vector<16x128xf32>
    %188 = tpu.matmul %187, %186, %cst_95 {dimension_numbers = #tpu.dot_dimension_numbers<[1], [0], [0], [1], [0, 0, 1, 1], [], []>} : vector<16x128xbf16>, vector<128x128xbf16>, vector<16x128xf32> -> vector<16x128xf32>
    %c2_96 = arith.constant 2 : index
    %c0_97 = arith.constant 0 : index
    %c0_98 = arith.constant 0 : index
    %189 = vector.load %arg7[%c2_96, %c0_97, %c0_98] : memref<4x1x128xf32, #tpu.memory_space<vmem>>, vector<1x1x128xf32>
    %190 = vector.shape_cast %189 : vector<1x1x128xf32> to vector<1x128xf32>
    %191 = vector.broadcast %190 : vector<1x128xf32> to vector<16x128xf32>
    %192 = arith.addf %188, %191 : vector<16x128xf32>
    %c7 = arith.constant 7 : index
    %193 = memref.load %arg18[%c7] : memref<12xf32, #tpu.memory_space<smem>>
    %cst_99 = arith.constant 0.000000e+00 : f32
    %194 = vector.broadcast %cst_99 : f32 to vector<16x128xf32>
    %195 = arith.cmpf oge, %192, %194 : vector<16x128xf32>
    %196 = vector.broadcast %193 : f32 to vector<16x128xf32>
    %197 = arith.mulf %196, %192 : vector<16x128xf32>
    %198 = arith.select %195, %192, %197 : vector<16x128xi1>, vector<16x128xf32>
    %c2_100 = arith.constant 2 : index
    %c0_101 = arith.constant 0 : index
    %c0_102 = arith.constant 0 : index
    %199 = vector.load %arg8[%c2_100, %c0_101, %c0_102] : memref<4x128x128xbf16, #tpu.memory_space<vmem>>, vector<1x128x128xbf16>
    %200 = vector.shape_cast %199 : vector<1x128x128xbf16> to vector<128x128xbf16>
    %201 = arith.truncf %198 : vector<16x128xf32> to vector<16x128xbf16>
    %cst_103 = arith.constant dense<0.000000e+00> : vector<16x128xf32>
    %202 = tpu.matmul %201, %200, %cst_103 {dimension_numbers = #tpu.dot_dimension_numbers<[1], [0], [0], [1], [0, 0, 1, 1], [], []>} : vector<16x128xbf16>, vector<128x128xbf16>, vector<16x128xf32> -> vector<16x128xf32>
    %c2_104 = arith.constant 2 : index
    %c0_105 = arith.constant 0 : index
    %c0_106 = arith.constant 0 : index
    %203 = vector.load %arg9[%c2_104, %c0_105, %c0_106] : memref<4x1x128xf32, #tpu.memory_space<vmem>>, vector<1x1x128xf32>
    %204 = vector.shape_cast %203 : vector<1x1x128xf32> to vector<1x128xf32>
    %205 = vector.broadcast %204 : vector<1x128xf32> to vector<16x128xf32>
    %206 = arith.addf %202, %205 : vector<16x128xf32>
    %c8 = arith.constant 8 : index
    %207 = memref.load %arg18[%c8] : memref<12xf32, #tpu.memory_space<smem>>
    %cst_107 = arith.constant 0.000000e+00 : f32
    %208 = vector.broadcast %cst_107 : f32 to vector<16x128xf32>
    %209 = arith.cmpf oge, %206, %208 : vector<16x128xf32>
    %210 = vector.broadcast %207 : f32 to vector<16x128xf32>
    %211 = arith.mulf %210, %206 : vector<16x128xf32>
    %212 = arith.select %209, %206, %211 : vector<16x128xi1>, vector<16x128xf32>
    %213 = vector.extract_strided_slice %177 {offsets = [0, 128], sizes = [16, 128], strides = [1, 1]} : vector<16x256xf32> to vector<16x128xf32>
    %214 = arith.addf %212, %213 : vector<16x128xf32>
    %cst_108 = arith.constant 0.000000e+00 : f32
    %215 = vector.broadcast %cst_108 : f32 to vector<16x128xf32>
    %216 = arith.maximumf %214, %215 : vector<16x128xf32>
    %c3_109 = arith.constant 3 : index
    %c0_110 = arith.constant 0 : index
    %c0_111 = arith.constant 0 : index
    %217 = vector.load %arg2[%c3_109, %c0_110, %c0_111] : memref<4x1x128xf32, #tpu.memory_space<vmem>>, vector<1x1x128xf32>
    %218 = vector.shape_cast %217 : vector<1x1x128xf32> to vector<1x128xf32>
    %c3_112 = arith.constant 3 : index
    %c0_113 = arith.constant 0 : index
    %c0_114 = arith.constant 0 : index
    %219 = vector.load %arg3[%c3_112, %c0_113, %c0_114] : memref<4x1x128xf32, #tpu.memory_space<vmem>>, vector<1x1x128xf32>
    %220 = vector.shape_cast %219 : vector<1x1x128xf32> to vector<1x128xf32>
    %cst_115 = arith.constant dense<0.000000e+00> : vector<128xf32>
    %221 = vector.multi_reduction <add>, %216, %cst_115 [0] : vector<16x128xf32> to vector<128xf32>
    %222 = vector.shape_cast %221 : vector<128xf32> to vector<1x128xf32>
    %cst_116 = arith.constant 1.600000e+01 : f32
    %223 = vector.broadcast %cst_116 : f32 to vector<1x128xf32>
    %224 = arith.divf %222, %223 : vector<1x128xf32>
    %225 = arith.mulf %216, %216 : vector<16x128xf32>
    %cst_117 = arith.constant dense<0.000000e+00> : vector<128xf32>
    %226 = vector.multi_reduction <add>, %225, %cst_117 [0] : vector<16x128xf32> to vector<128xf32>
    %227 = vector.shape_cast %226 : vector<128xf32> to vector<1x128xf32>
    %cst_118 = arith.constant 1.600000e+01 : f32
    %228 = vector.broadcast %cst_118 : f32 to vector<1x128xf32>
    %229 = arith.divf %227, %228 : vector<1x128xf32>
    %230 = arith.mulf %224, %224 : vector<1x128xf32>
    %231 = arith.subf %229, %230 : vector<1x128xf32>
    %cst_119 = arith.constant 9.99999974E-6 : f32
    %232 = vector.broadcast %cst_119 : f32 to vector<1x128xf32>
    %233 = arith.addf %231, %232 : vector<1x128xf32>
    %234 = math.rsqrt %233 : vector<1x128xf32>
    %235 = arith.mulf %218, %234 : vector<1x128xf32>
    %236 = arith.mulf %224, %235 : vector<1x128xf32>
    %237 = arith.subf %220, %236 : vector<1x128xf32>
    %238 = vector.broadcast %235 : vector<1x128xf32> to vector<16x128xf32>
    %239 = arith.mulf %216, %238 : vector<16x128xf32>
    %240 = vector.broadcast %237 : vector<1x128xf32> to vector<16x128xf32>
    %241 = arith.addf %239, %240 : vector<16x128xf32>
    %c3_120 = arith.constant 3 : index
    %c0_121 = arith.constant 0 : index
    %c0_122 = arith.constant 0 : index
    %242 = vector.load %arg4[%c3_120, %c0_121, %c0_122] : memref<4x128x256xbf16, #tpu.memory_space<vmem>>, vector<1x128x256xbf16>
    %243 = vector.shape_cast %242 : vector<1x128x256xbf16> to vector<128x256xbf16>
    %244 = arith.truncf %241 : vector<16x128xf32> to vector<16x128xbf16>
    %cst_123 = arith.constant dense<0.000000e+00> : vector<16x256xf32>
    %245 = tpu.matmul %244, %243, %cst_123 {dimension_numbers = #tpu.dot_dimension_numbers<[1], [0], [0], [1], [0, 0, 1, 1], [], []>} : vector<16x128xbf16>, vector<128x256xbf16>, vector<16x256xf32> -> vector<16x256xf32>
    %c3_124 = arith.constant 3 : index
    %c0_125 = arith.constant 0 : index
    %c0_126 = arith.constant 0 : index
    %246 = vector.load %arg5[%c3_124, %c0_125, %c0_126] : memref<4x1x256xf32, #tpu.memory_space<vmem>>, vector<1x1x256xf32>
    %247 = vector.shape_cast %246 : vector<1x1x256xf32> to vector<1x256xf32>
    %248 = vector.broadcast %247 : vector<1x256xf32> to vector<16x256xf32>
    %249 = arith.addf %245, %248 : vector<16x256xf32>
    %250 = vector.extract_strided_slice %249 {offsets = [0, 0], sizes = [16, 128], strides = [1, 1]} : vector<16x256xf32> to vector<16x128xf32>
    %c9 = arith.constant 9 : index
    %251 = memref.load %arg18[%c9] : memref<12xf32, #tpu.memory_space<smem>>
    %cst_127 = arith.constant 0.000000e+00 : f32
    %252 = vector.broadcast %cst_127 : f32 to vector<16x128xf32>
    %253 = arith.cmpf oge, %250, %252 : vector<16x128xf32>
    %254 = vector.broadcast %251 : f32 to vector<16x128xf32>
    %255 = arith.mulf %254, %250 : vector<16x128xf32>
    %256 = arith.select %253, %250, %255 : vector<16x128xi1>, vector<16x128xf32>
    %c3_128 = arith.constant 3 : index
    %c0_129 = arith.constant 0 : index
    %c0_130 = arith.constant 0 : index
    %257 = vector.load %arg6[%c3_128, %c0_129, %c0_130] : memref<4x128x128xbf16, #tpu.memory_space<vmem>>, vector<1x128x128xbf16>
    %258 = vector.shape_cast %257 : vector<1x128x128xbf16> to vector<128x128xbf16>
    %259 = arith.truncf %256 : vector<16x128xf32> to vector<16x128xbf16>
    %cst_131 = arith.constant dense<0.000000e+00> : vector<16x128xf32>
    %260 = tpu.matmul %259, %258, %cst_131 {dimension_numbers = #tpu.dot_dimension_numbers<[1], [0], [0], [1], [0, 0, 1, 1], [], []>} : vector<16x128xbf16>, vector<128x128xbf16>, vector<16x128xf32> -> vector<16x128xf32>
    %c3_132 = arith.constant 3 : index
    %c0_133 = arith.constant 0 : index
    %c0_134 = arith.constant 0 : index
    %261 = vector.load %arg7[%c3_132, %c0_133, %c0_134] : memref<4x1x128xf32, #tpu.memory_space<vmem>>, vector<1x1x128xf32>
    %262 = vector.shape_cast %261 : vector<1x1x128xf32> to vector<1x128xf32>
    %263 = vector.broadcast %262 : vector<1x128xf32> to vector<16x128xf32>
    %264 = arith.addf %260, %263 : vector<16x128xf32>
    %c10 = arith.constant 10 : index
    %265 = memref.load %arg18[%c10] : memref<12xf32, #tpu.memory_space<smem>>
    %cst_135 = arith.constant 0.000000e+00 : f32
    %266 = vector.broadcast %cst_135 : f32 to vector<16x128xf32>
    %267 = arith.cmpf oge, %264, %266 : vector<16x128xf32>
    %268 = vector.broadcast %265 : f32 to vector<16x128xf32>
    %269 = arith.mulf %268, %264 : vector<16x128xf32>
    %270 = arith.select %267, %264, %269 : vector<16x128xi1>, vector<16x128xf32>
    %c3_136 = arith.constant 3 : index
    %c0_137 = arith.constant 0 : index
    %c0_138 = arith.constant 0 : index
    %271 = vector.load %arg8[%c3_136, %c0_137, %c0_138] : memref<4x128x128xbf16, #tpu.memory_space<vmem>>, vector<1x128x128xbf16>
    %272 = vector.shape_cast %271 : vector<1x128x128xbf16> to vector<128x128xbf16>
    %273 = arith.truncf %270 : vector<16x128xf32> to vector<16x128xbf16>
    %cst_139 = arith.constant dense<0.000000e+00> : vector<16x128xf32>
    %274 = tpu.matmul %273, %272, %cst_139 {dimension_numbers = #tpu.dot_dimension_numbers<[1], [0], [0], [1], [0, 0, 1, 1], [], []>} : vector<16x128xbf16>, vector<128x128xbf16>, vector<16x128xf32> -> vector<16x128xf32>
    %c3_140 = arith.constant 3 : index
    %c0_141 = arith.constant 0 : index
    %c0_142 = arith.constant 0 : index
    %275 = vector.load %arg9[%c3_140, %c0_141, %c0_142] : memref<4x1x128xf32, #tpu.memory_space<vmem>>, vector<1x1x128xf32>
    %276 = vector.shape_cast %275 : vector<1x1x128xf32> to vector<1x128xf32>
    %277 = vector.broadcast %276 : vector<1x128xf32> to vector<16x128xf32>
    %278 = arith.addf %274, %277 : vector<16x128xf32>
    %c11 = arith.constant 11 : index
    %279 = memref.load %arg18[%c11] : memref<12xf32, #tpu.memory_space<smem>>
    %cst_143 = arith.constant 0.000000e+00 : f32
    %280 = vector.broadcast %cst_143 : f32 to vector<16x128xf32>
    %281 = arith.cmpf oge, %278, %280 : vector<16x128xf32>
    %282 = vector.broadcast %279 : f32 to vector<16x128xf32>
    %283 = arith.mulf %282, %278 : vector<16x128xf32>
    %284 = arith.select %281, %278, %283 : vector<16x128xi1>, vector<16x128xf32>
    %285 = vector.extract_strided_slice %249 {offsets = [0, 128], sizes = [16, 128], strides = [1, 1]} : vector<16x256xf32> to vector<16x128xf32>
    %286 = arith.addf %284, %285 : vector<16x128xf32>
    %cst_144 = arith.constant 0.000000e+00 : f32
    %287 = vector.broadcast %cst_144 : f32 to vector<16x128xf32>
    %288 = arith.maximumf %286, %287 : vector<16x128xf32>
    %c0_145 = arith.constant 0 : index
    %c0_146 = arith.constant 0 : index
    %289 = vector.load %arg0[%c0_145, %c0_146] : memref<16x1xi32, #tpu.memory_space<vmem>>, vector<16x1xi32>
    %c0_i32 = arith.constant 0 : i32
    %290 = vector.broadcast %c0_i32 : i32 to vector<16x1xi32>
    %291 = arith.cmpi eq, %289, %290 : vector<16x1xi32>
    %292 = arith.extui %291 : vector<16x1xi1> to vector<16x1xi32>
    %293 = arith.sitofp %292 : vector<16x1xi32> to vector<16x1xf32>
    %294 = vector.broadcast %293 : vector<16x1xf32> to vector<16x128xf32>
    %295 = arith.mulf %288, %294 : vector<16x128xf32>
    %cst_147 = arith.constant dense<0.000000e+00> : vector<128xf32>
    %296 = vector.multi_reduction <add>, %295, %cst_147 [0] : vector<16x128xf32> to vector<128xf32>
    %297 = vector.shape_cast %296 : vector<128xf32> to vector<1x128xf32>
    %c0_148 = arith.constant 0 : index
    %c0_149 = arith.constant 0 : index
    %298 = vector.load %arg0[%c0_148, %c0_149] : memref<16x1xi32, #tpu.memory_space<vmem>>, vector<16x1xi32>
    %c1_i32 = arith.constant 1 : i32
    %299 = vector.broadcast %c1_i32 : i32 to vector<16x1xi32>
    %300 = arith.cmpi eq, %298, %299 : vector<16x1xi32>
    %301 = arith.extui %300 : vector<16x1xi1> to vector<16x1xi32>
    %302 = arith.sitofp %301 : vector<16x1xi32> to vector<16x1xf32>
    %303 = vector.broadcast %302 : vector<16x1xf32> to vector<16x128xf32>
    %304 = arith.mulf %288, %303 : vector<16x128xf32>
    %cst_150 = arith.constant dense<0.000000e+00> : vector<128xf32>
    %305 = vector.multi_reduction <add>, %304, %cst_150 [0] : vector<16x128xf32> to vector<128xf32>
    %306 = vector.shape_cast %305 : vector<128xf32> to vector<1x128xf32>
    %307 = tpu.concatenate %297, %306 in 0 : vector<1x128xf32>, vector<1x128xf32> -> vector<2x128xf32>
    %c0_151 = arith.constant 0 : index
    %c0_152 = arith.constant 0 : index
    %c0_153 = arith.constant 0 : index
    %308 = vector.load %arg10[%c0_151, %c0_152, %c0_153] : memref<1x1x128xf32, #tpu.memory_space<vmem>>, vector<1x1x128xf32>
    %309 = vector.shape_cast %308 : vector<1x1x128xf32> to vector<1x128xf32>
    %c0_154 = arith.constant 0 : index
    %c0_155 = arith.constant 0 : index
    %c0_156 = arith.constant 0 : index
    %310 = vector.load %arg11[%c0_154, %c0_155, %c0_156] : memref<1x1x128xf32, #tpu.memory_space<vmem>>, vector<1x1x128xf32>
    %311 = vector.shape_cast %310 : vector<1x1x128xf32> to vector<1x128xf32>
    %cst_157 = arith.constant dense<0.000000e+00> : vector<128xf32>
    %312 = vector.multi_reduction <add>, %307, %cst_157 [0] : vector<2x128xf32> to vector<128xf32>
    %313 = vector.shape_cast %312 : vector<128xf32> to vector<1x128xf32>
    %cst_158 = arith.constant 2.000000e+00 : f32
    %314 = vector.broadcast %cst_158 : f32 to vector<1x128xf32>
    %315 = arith.divf %313, %314 : vector<1x128xf32>
    %316 = arith.mulf %307, %307 : vector<2x128xf32>
    %cst_159 = arith.constant dense<0.000000e+00> : vector<128xf32>
    %317 = vector.multi_reduction <add>, %316, %cst_159 [0] : vector<2x128xf32> to vector<128xf32>
    %318 = vector.shape_cast %317 : vector<128xf32> to vector<1x128xf32>
    %cst_160 = arith.constant 2.000000e+00 : f32
    %319 = vector.broadcast %cst_160 : f32 to vector<1x128xf32>
    %320 = arith.divf %318, %319 : vector<1x128xf32>
    %321 = arith.mulf %315, %315 : vector<1x128xf32>
    %322 = arith.subf %320, %321 : vector<1x128xf32>
    %cst_161 = arith.constant 9.99999974E-6 : f32
    %323 = vector.broadcast %cst_161 : f32 to vector<1x128xf32>
    %324 = arith.addf %322, %323 : vector<1x128xf32>
    %325 = math.rsqrt %324 : vector<1x128xf32>
    %326 = arith.mulf %309, %325 : vector<1x128xf32>
    %327 = arith.mulf %315, %326 : vector<1x128xf32>
    %328 = arith.subf %311, %327 : vector<1x128xf32>
    %329 = vector.broadcast %326 : vector<1x128xf32> to vector<2x128xf32>
    %330 = arith.mulf %307, %329 : vector<2x128xf32>
    %331 = vector.broadcast %328 : vector<1x128xf32> to vector<2x128xf32>
    %332 = arith.addf %330, %331 : vector<2x128xf32>
    %c0_162 = arith.constant 0 : index
    %c0_163 = arith.constant 0 : index
    %c0_164 = arith.constant 0 : index
    %333 = vector.load %arg12[%c0_162, %c0_163, %c0_164] : memref<1x128x128xbf16, #tpu.memory_space<vmem>>, vector<1x128x128xbf16>
    %334 = vector.shape_cast %333 : vector<1x128x128xbf16> to vector<128x128xbf16>
    %335 = arith.truncf %332 : vector<2x128xf32> to vector<2x128xbf16>
    %cst_165 = arith.constant dense<0.000000e+00> : vector<2x128xf32>
    %336 = tpu.matmul %335, %334, %cst_165 {dimension_numbers = #tpu.dot_dimension_numbers<[1], [0], [0], [1], [0, 0, 1, 1], [], []>} : vector<2x128xbf16>, vector<128x128xbf16>, vector<2x128xf32> -> vector<2x128xf32>
    %c0_166 = arith.constant 0 : index
    %c0_167 = arith.constant 0 : index
    %c0_168 = arith.constant 0 : index
    %337 = vector.load %arg13[%c0_166, %c0_167, %c0_168] : memref<1x1x128xf32, #tpu.memory_space<vmem>>, vector<1x1x128xf32>
    %338 = vector.shape_cast %337 : vector<1x1x128xf32> to vector<1x128xf32>
    %339 = vector.broadcast %338 : vector<1x128xf32> to vector<2x128xf32>
    %340 = arith.addf %336, %339 : vector<2x128xf32>
    %cst_169 = arith.constant 0.000000e+00 : f32
    %341 = vector.broadcast %cst_169 : f32 to vector<2x128xf32>
    %342 = arith.maximumf %340, %341 : vector<2x128xf32>
    %c0_170 = arith.constant 0 : index
    %c0_171 = arith.constant 0 : index
    %343 = vector.load %arg14[%c0_170, %c0_171] : memref<1x128xf32, #tpu.memory_space<vmem>>, vector<1x128xf32>
    %c0_172 = arith.constant 0 : index
    %c0_173 = arith.constant 0 : index
    %344 = vector.load %arg15[%c0_172, %c0_173] : memref<1x128xf32, #tpu.memory_space<vmem>>, vector<1x128xf32>
    %cst_174 = arith.constant dense<0.000000e+00> : vector<128xf32>
    %345 = vector.multi_reduction <add>, %342, %cst_174 [0] : vector<2x128xf32> to vector<128xf32>
    %346 = vector.shape_cast %345 : vector<128xf32> to vector<1x128xf32>
    %cst_175 = arith.constant 2.000000e+00 : f32
    %347 = vector.broadcast %cst_175 : f32 to vector<1x128xf32>
    %348 = arith.divf %346, %347 : vector<1x128xf32>
    %349 = arith.mulf %342, %342 : vector<2x128xf32>
    %cst_176 = arith.constant dense<0.000000e+00> : vector<128xf32>
    %350 = vector.multi_reduction <add>, %349, %cst_176 [0] : vector<2x128xf32> to vector<128xf32>
    %351 = vector.shape_cast %350 : vector<128xf32> to vector<1x128xf32>
    %cst_177 = arith.constant 2.000000e+00 : f32
    %352 = vector.broadcast %cst_177 : f32 to vector<1x128xf32>
    %353 = arith.divf %351, %352 : vector<1x128xf32>
    %354 = arith.mulf %348, %348 : vector<1x128xf32>
    %355 = arith.subf %353, %354 : vector<1x128xf32>
    %cst_178 = arith.constant 9.99999974E-6 : f32
    %356 = vector.broadcast %cst_178 : f32 to vector<1x128xf32>
    %357 = arith.addf %355, %356 : vector<1x128xf32>
    %358 = math.rsqrt %357 : vector<1x128xf32>
    %359 = arith.mulf %343, %358 : vector<1x128xf32>
    %360 = arith.mulf %348, %359 : vector<1x128xf32>
    %361 = arith.subf %344, %360 : vector<1x128xf32>
    %362 = vector.broadcast %359 : vector<1x128xf32> to vector<2x128xf32>
    %363 = arith.mulf %342, %362 : vector<2x128xf32>
    %364 = vector.broadcast %361 : vector<1x128xf32> to vector<2x128xf32>
    %365 = arith.addf %363, %364 : vector<2x128xf32>
    %c0_179 = arith.constant 0 : index
    %c0_180 = arith.constant 0 : index
    %366 = vector.load %arg16[%c0_179, %c0_180] : memref<128x128xbf16, #tpu.memory_space<vmem>>, vector<128x128xbf16>
    %367 = arith.truncf %365 : vector<2x128xf32> to vector<2x128xbf16>
    %cst_181 = arith.constant dense<0.000000e+00> : vector<2x128xf32>
    %368 = tpu.matmul %367, %366, %cst_181 {dimension_numbers = #tpu.dot_dimension_numbers<[1], [0], [0], [1], [0, 0, 1, 1], [], []>} : vector<2x128xbf16>, vector<128x128xbf16>, vector<2x128xf32> -> vector<2x128xf32>
    %c0_182 = arith.constant 0 : index
    %c0_183 = arith.constant 0 : index
    %369 = vector.load %arg17[%c0_182, %c0_183] : memref<1x128xf32, #tpu.memory_space<vmem>>, vector<1x128xf32>
    %370 = vector.broadcast %369 : vector<1x128xf32> to vector<2x128xf32>
    %371 = arith.addf %368, %370 : vector<2x128xf32>
    %cst_184 = arith.constant dense<0xFF800000> : vector<2xf32>
    %372 = vector.multi_reduction <maximumf>, %371, %cst_184 [1] : vector<2x128xf32> to vector<2xf32>
    %373 = vector.shape_cast %372 : vector<2xf32> to vector<2x1xf32>
    %374 = vector.broadcast %373 : vector<2x1xf32> to vector<2x128xf32>
    %375 = arith.subf %371, %374 : vector<2x128xf32>
    %376 = math.exp %375 : vector<2x128xf32>
    %cst_185 = arith.constant dense<0.000000e+00> : vector<2xf32>
    %377 = vector.multi_reduction <add>, %376, %cst_185 [1] : vector<2x128xf32> to vector<2xf32>
    %378 = vector.shape_cast %377 : vector<2xf32> to vector<2x1xf32>
    %379 = math.log %378 : vector<2x1xf32>
    %380 = vector.broadcast %379 : vector<2x1xf32> to vector<2x128xf32>
    %381 = arith.subf %375, %380 : vector<2x128xf32>
    %c0_186 = arith.constant 0 : index
    %c0_187 = arith.constant 0 : index
    %382 = vector.load %arg19[%c0_186, %c0_187] : memref<2x128xf32, #tpu.memory_space<vmem>>, vector<2x128xf32>
    tpu.vector_store %arg19[%c0_186, %c0_187], %381 {strides = array<i32>} : memref<2x128xf32, #tpu.memory_space<vmem>>, vector<2x128xf32>,
    return
  }
}

</mosaic_0001>

<bundles_post_ra>
// kernel: tpu_custom_call.1
= control target key start
LH: loop header
LB: loop body
LE: loop exit
PB: predicated region body
PF: predicated region fallthrough
CT: control target
= control target key end

     0   :  { %s4034_s0 = inlined_call_operand.vmem [shape: s32[16,1], index: 0, kind: input, shape index: {}]   ;;  %s4035_s1 = inlined_call_operand.hbm [shape: f32[16,128], index: 1, kind: input, shape index: {}]   ;;  %s4036_s2 = inlined_call_operand.vmem [shape: f32[4,1,128], index: 2, kind: input, shape index: {}]   ;;  %s4037_s3 = inlined_call_operand.hbm [shape: f32[4,1,128], index: 3, kind: input, shape index: {}]   ;;  %s4038_s4 = inlined_call_operand.hbm [shape: bf16[4,128,256], index: 4, kind: input, shape index: {}]   ;;  %s4039_s5 = inlined_call_operand.vmem [shape: f32[4,1,256], index: 5, kind: input, shape index: {}]   ;;  %s4040_s6 = inlined_call_operand.hbm [shape: bf16[4,128,128], index: 6, kind: input, shape index: {}]   ;;  %s4041_s7 = inlined_call_operand.hbm [shape: f32[4,1,128], index: 7, kind: input, shape index: {}]   ;;  %s4042_s8 = inlined_call_operand.hbm [shape: bf16[4,128,128], index: 8, kind: input, shape index: {}]   ;;  %s4043_s9 = inlined_call_operand.hbm [shape: f32[4,1,128], index: 9, kind: input, shape index: {}]   ;;  %s4044_s10 = inlined_call_operand.vmem [shape: f32[1,1,128], index: 10, kind: input, shape index: {}]   ;;  %s4045_s11 = inlined_call_operand.hbm [shape: f32[1,1,128], index: 11, kind: input, shape index: {}]   ;;  %s4046_s12 = inlined_call_operand.hbm [shape: bf16[1,128,128], index: 12, kind: input, shape index: {}]   ;;  %s4047_s13 = inlined_call_operand.hbm [shape: f32[1,1,128], index: 13, kind: input, shape index: {}]   ;;  %s4048_s14 = inlined_call_operand.hbm [shape: f32[1,128], index: 14, kind: input, shape index: {}]   ;;  %s4049_s15 = inlined_call_operand.hbm [shape: f32[1,128], index: 15, kind: input, shape index: {}]   ;;  %s4050_s16 = inlined_call_operand.vmem [shape: bf16[128,128], index: 16, kind: input, shape index: {}]   ;;  %s4051_s17 = inlined_call_operand.vmem [shape: f32[1,128], index: 17, kind: input, shape index: {}]   ;;  %s4052_s18 = inlined_call_operand.vmem [shape: f32[12], index: 18, kind: input, shape index: {}]   ;;  %s4053_s19 = inlined_call_operand.hbm [shape: f32[2,128], index: 19, kind: output, shape index: {}]  }
   0x1   :  { %4063 = sst [smem:[#allocation34_spill]] %s4034_s0 }
   0x2   :  { %4064 = sst [smem:[#allocation35_spill]] %s4035_s1 }
   0x3   :  { %4065 = sst [smem:[#allocation36_spill]] %s4036_s2 }
   0x4   :  { %4066 = sst [smem:[#allocation37_spill]] %s4037_s3 }
   0x5   :  { %4067 = sst [smem:[#allocation38_spill]] %s4053_s19 }
   0x6   :  { %24 = vsyncpa [#allocation3], 0 }
   0x7   :  { %25 = vsyncpa [#allocation7], 0 }
   0x8   :  { %26 = vsyncpa [#allocation10], 0 }
   0x9   :  { %27 = vsyncpa [#allocation13], 0 }
   0xa   :  { %28 = vsyncpa [#allocation16], 0 }
   0xb   :  { %29 = vsyncpa [#allocation19], 0 }
   0xc   :  { %30 = vsyncpa [#allocation22], 0 }
   0xd   :  { %31 = vsyncpa [#allocation5], 0 }
   0xe   :  { %32 = vsyncpa [#allocation4], 0  ;;  %s3458_s0 = smov [#allocation6]   ;;  %s4068_s1 = sld [smem:[#allocation37_spill]] }
   0xf   :  { %s54_s30 = sshll.u32 %s3458_s0, 4  ;;  %s55_s30 = int_to_ptr.vmem [resolvable:$true] %s54_s30 }
  0x14   :  { %s3142_s22 = scalar_lea.hbm %s4068_s1, 64 }
  0x15   :  { %p3143_p0 = scmp.ne.s32.totalorder %s4068_s1, %s3142_s22  ;;  %p3146_p1 = scmp.lt.u32.totalorder %s3142_s22, %s4068_s1 }
  0x17   :  { %p3148_p2 = pnand %p3146_p1, %p3143_p0 }
  0x19   :  { %3151 = shalt.err (!%p3148_p2)
}
  0x1a   :  { %s3152_s3 = scalar_lea.vmem %s55_s30, 64  ;;  %p3157_p4 = scmp.lt.s32.totalorder %s55_s30, %s55_s30 }
  0x1b   :  { %p3153_p3 = scmp.ne.s32.totalorder %s55_s30, %s3152_s3  ;;  %p3158_p5 = scmp.lt.s32.totalorder %s3152_s3, %s3152_s3 }
  0x1d   :  { %p3159_p6 = por %p3158_p5, %p3157_p4 }
  0x1f   :  { %p3160_p7 = pnand %p3159_p6, %p3153_p3 }
  0x21   :  { %3163 = shalt.err (!%p3160_p7)
}
  0x22   :  { %s4059_s26 = smov 16   ;;  %s4061_s27 = smov 1  }
  0x23   :  { %60 = dma.hbm_to_vmem [thread:$0]  %s4068_s1, 64, %s55_s30, [#allocation7], %s4059_s26, %s4059_s26, %s4061_s27  }
  0x24   :  { %s3461_s0 = smov [#allocation9]   ;;  %s3164_s2 = scalar_lea.hbm %s4040_s6, 4096 }
  0x25   :  { %s80_s20 = sshll.u32 %s3461_s0, 4  ;;  %p3165_p8 = scmp.ne.s32.totalorder %s4040_s6, %s3164_s2  ;;  %s81_s20 = int_to_ptr.vmem [resolvable:$true] %s80_s20 }
  0x26   :  { %p3168_p9 = scmp.lt.u32.totalorder %s3164_s2, %s4040_s6 }
  0x28   :  { %p3170_p10 = pnand %p3168_p9, %p3165_p8 }
  0x2a   :  { %3173 = shalt.err (!%p3170_p10)
}
  0x2b   :  { %s3174_s19 = scalar_lea.vmem %s81_s20, 4096  ;;  %p3179_p12 = scmp.lt.s32.totalorder %s81_s20, %s81_s20 }
  0x2c   :  { %p3175_p11 = scmp.ne.s32.totalorder %s81_s20, %s3174_s19  ;;  %p3180_p13 = scmp.lt.s32.totalorder %s3174_s19, %s3174_s19 }
  0x2e   :  { %p3181_p0 = por %p3180_p13, %p3179_p12 }
  0x30   :  { %p3182_p1 = pnand %p3181_p0, %p3175_p11 }
  0x32   :  { %3185 = shalt.err (!%p3182_p1)
}
  0x33   :  { %s3462_s30 = smov 64   ;;  %s3463_s1 = smov 4  }
  0x34   :  { %86 = dma.hbm_to_vmem [thread:$0]  %s4040_s6, 4096, %s81_s20, [#allocation10], %s3462_s30, %s3462_s30, %s3463_s1  }
  0x35   :  { %s3464_s0 = smov [#allocation12]   ;;  %s3465_s22 = smov [#allocation15]  }
  0x36   :  { %s104_s21 = sshll.u32 %s3464_s0, 4  ;;  %s131_s2 = sshll.u32 %s3465_s22, 4  ;;  %s105_s21 = int_to_ptr.vmem [resolvable:$true] %s104_s21  ;;  %s132_s2 = int_to_ptr.vmem [resolvable:$true] %s131_s2 }
  0x37   :  { %s3186_s24 = scalar_lea.hbm %s4042_s8, 4096 }
  0x38   :  { %p3187_p2 = scmp.ne.s32.totalorder %s4042_s8, %s3186_s24  ;;  %p3190_p3 = scmp.lt.u32.totalorder %s3186_s24, %s4042_s8 }
  0x3a   :  { %p3192_p4 = pnand %p3190_p3, %p3187_p2 }
  0x3c   :  { %3195 = shalt.err (!%p3192_p4)
}
  0x3d   :  { %s3196_s6 = scalar_lea.vmem %s105_s21, 4096  ;;  %p3201_p6 = scmp.lt.s32.totalorder %s105_s21, %s105_s21 }
  0x3e   :  { %p3197_p5 = scmp.ne.s32.totalorder %s105_s21, %s3196_s6  ;;  %p3202_p7 = scmp.lt.s32.totalorder %s3196_s6, %s3196_s6 }
  0x40   :  { %p3203_p8 = por %p3202_p7, %p3201_p6 }
  0x42   :  { %p3204_p9 = pnand %p3203_p8, %p3197_p5 }
  0x44   :  { %3207 = shalt.err (!%p3204_p9)
}
  0x45   :  { %110 = dma.hbm_to_vmem [thread:$0]  %s4042_s8, 4096, %s105_s21, [#allocation13], %s3462_s30, %s3462_s30, %s3463_s1  }
  0x46   :  { %s3208_s26 = scalar_lea.hbm %s4045_s11, 16 }
  0x47   :  { %p3209_p10 = scmp.ne.s32.totalorder %s4045_s11, %s3208_s26  ;;  %p3212_p11 = scmp.lt.u32.totalorder %s3208_s26, %s4045_s11 }
  0x49   :  { %p3214_p12 = pnand %p3212_p11, %p3209_p10 }
  0x4b   :  { %3217 = shalt.err (!%p3214_p12)
}
  0x4c   :  { %s3218_s24 = scalar_lea.vmem %s132_s2, 16  ;;  %s3222_s25 = scalar_lea.vmem %s132_s2, 32 }
  0x4d   :  { %p3219_p13 = scmp.ne.s32.totalorder %s132_s2, %s3218_s24  ;;  %p3223_p0 = scmp.lt.s32.totalorder %s132_s2, %s132_s2 }
  0x4e   :  { %p3224_p1 = scmp.lt.s32.totalorder %s3222_s25, %s3218_s24 }
  0x50   :  { %p3225_p2 = por %p3224_p1, %p3223_p0 }
  0x52   :  { %p3226_p3 = pnand %p3225_p2, %p3219_p13 }
  0x54   :  { %3229 = shalt.err (!%p3226_p3)
}
  0x55   :  { %134 = dma.hbm_to_vmem [thread:$0]  %s4045_s11, 16, %s132_s2, [#allocation16]  }
  0x56   :  { %s3466_s3 = smov [#allocation18]   ;;  %s3467_s20 = smov [#allocation2]  }
  0x57   :  { %s153_s6 = sshll.u32 %s3466_s3, 4  ;;  %s40_s28 = sshll.u32 %s3467_s20, 4  ;;  %s154_s6 = int_to_ptr.vmem [resolvable:$true] %s153_s6  ;;  %s3638_s28 = int_to_ptr.vmem [resolvable:$true] %s40_s28 }
  0x58   :  { %s3230_s26 = scalar_lea.hbm %s4047_s13, 16 }
  0x59   :  { %p3231_p4 = scmp.ne.s32.totalorder %s4047_s13, %s3230_s26  ;;  %p3234_p5 = scmp.lt.u32.totalorder %s3230_s26, %s4047_s13 }
  0x5b   :  { %p3236_p6 = pnand %p3234_p5, %p3231_p4 }
  0x5d   :  { %3239 = shalt.err (!%p3236_p6)
}
  0x5e   :  { %s3240_s11 = scalar_lea.vmem %s154_s6, 16  ;;  %s3244_s2 = scalar_lea.vmem %s154_s6, 32 }
  0x5f   :  { %p3241_p7 = scmp.ne.s32.totalorder %s154_s6, %s3240_s11  ;;  %p3245_p8 = scmp.lt.s32.totalorder %s154_s6, %s154_s6 }
  0x60   :  { %p3246_p9 = scmp.lt.s32.totalorder %s3244_s2, %s3240_s11 }
  0x62   :  { %p3247_p10 = por %p3246_p9, %p3245_p8 }
  0x64   :  { %p3248_p11 = pnand %p3247_p10, %p3241_p7 }
  0x66   :  { %3251 = shalt.err (!%p3248_p11)
}
  0x67   :  { %156 = dma.hbm_to_vmem [thread:$0]  %s4047_s13, 16, %s154_s6, [#allocation19]  }
  0x68   :  { %s4069_s3 = sld [smem:[#allocation35_spill]] }
  0x6e   :  { %s3252_s20 = scalar_lea.hbm %s4069_s3, 256 }
  0x6f   :  { %p3253_p12 = scmp.ne.s32.totalorder %s4069_s3, %s3252_s20  ;;  %p3256_p13 = scmp.lt.u32.totalorder %s3252_s20, %s4069_s3 }
  0x71   :  { %p3258_p0 = pnand %p3256_p13, %p3253_p12 }
  0x73   :  { %3261 = shalt.err (!%p3258_p0)
}
  0x74   :  { %s3262_s22 = scalar_lea.vmem %s3638_s28, 256  ;;  %p3267_p2 = scmp.lt.s32.totalorder %s3638_s28, %s3638_s28 }
  0x75   :  { %p3263_p1 = scmp.ne.s32.totalorder %s3638_s28, %s3262_s22  ;;  %p3268_p3 = scmp.lt.s32.totalorder %s3262_s22, %s3262_s22 }
  0x77   :  { %p3269_p4 = por %p3268_p3, %p3267_p2 }
  0x79   :  { %p3270_p5 = pnand %p3269_p4, %p3263_p1 }
  0x7b   :  { %3273 = shalt.err (!%p3270_p5)
}
  0x7c   :  { %s3468_s13 = smov 128   ;;  %s3469_s6 = smov 8  }
  0x7d   :  { %46 = dma.hbm_to_vmem [thread:$0]  %s4069_s3, 256, %s3638_s28, [#allocation3], %s3468_s13, %s3468_s13, %s3469_s6  }
  0x7e   :  { %s3470_s11 = smov [#allocation8]   ;;  %s3471_s24 = smov [#allocation11]  }
  0x7f   :  { %s66_s2 = sshll.u32 %s3470_s11, 4  ;;  %s92_s25 = sshll.u32 %s3471_s24, 4  ;;  %s67_s2 = int_to_ptr.vmem [resolvable:$true] %s66_s2  ;;  %s3669_s25 = int_to_ptr.vmem [resolvable:$true] %s92_s25 }
  0x80   :  { %s3274_s20 = scalar_lea.hbm %s4038_s4, 8192 }
  0x81   :  { %p3275_p6 = scmp.ne.s32.totalorder %s4038_s4, %s3274_s20  ;;  %p3278_p7 = scmp.lt.u32.totalorder %s3274_s20, %s4038_s4 }
  0x83   :  { %p3280_p8 = pnand %p3278_p7, %p3275_p6 }
  0x85   :  { %3283 = shalt.err (!%p3280_p8)
}
  0x86   :  { %s3284_s28 = scalar_lea.vmem %s67_s2, 8192  ;;  %p3289_p10 = scmp.lt.s32.totalorder %s67_s2, %s67_s2 }
  0x87   :  { %p3285_p9 = scmp.ne.s32.totalorder %s67_s2, %s3284_s28  ;;  %p3290_p11 = scmp.lt.s32.totalorder %s3284_s28, %s3284_s28 }
  0x89   :  { %p3291_p12 = por %p3290_p11, %p3289_p10 }
  0x8b   :  { %p3292_p13 = pnand %p3291_p12, %p3285_p9 }
  0x8d   :  { %3295 = shalt.err (!%p3292_p13)
}
  0x8e   :  { %72 = dma.hbm_to_vmem [thread:$0]  %s4038_s4, 8192, %s67_s2, [#allocation7], %s3468_s13, %s3468_s13, %s3469_s6  }
  0x8f   :  { %s3296_s11 = scalar_lea.hbm %s4041_s7, 64 }
  0x90   :  { %p3297_p0 = scmp.ne.s32.totalorder %s4041_s7, %s3296_s11  ;;  %p3300_p1 = scmp.lt.u32.totalorder %s3296_s11, %s4041_s7 }
  0x92   :  { %p3302_p2 = pnand %p3300_p1, %p3297_p0 }
  0x94   :  { %3305 = shalt.err (!%p3302_p2)
}
  0x95   :  { %s3306_s29 = scalar_lea.vmem %s3669_s25, 64  ;;  %p3311_p4 = scmp.lt.s32.totalorder %s3669_s25, %s3669_s25 }
  0x96   :  { %p3307_p3 = scmp.ne.s32.totalorder %s3669_s25, %s3306_s29  ;;  %p3312_p5 = scmp.lt.s32.totalorder %s3306_s29, %s3306_s29 }
  0x98   :  { %p3313_p6 = por %p3312_p5, %p3311_p4 }
  0x9a   :  { %p3314_p7 = pnand %p3313_p6, %p3307_p3 }
  0x9c   :  { %3317 = shalt.err (!%p3314_p7)
}
  0x9d   :  { %s4070_s4 = smov 1   ;;  %s4071_s13 = smov 16  }
  0x9e   :  { %98 = dma.hbm_to_vmem [thread:$0]  %s4041_s7, 64, %s3669_s25, [#allocation10], %s4071_s13, %s4071_s13, %s4070_s4  }
  0x9f   :  { %s3472_s0 = smov [#allocation14]   ;;  %s3473_s27 = smov [#allocation17]  }
  0xa0   :  { %s116_s26 = sshll.u32 %s3472_s0, 4  ;;  %s140_s28 = sshll.u32 %s3473_s27, 4  ;;  %s117_s26 = int_to_ptr.vmem [resolvable:$true] %s116_s26  ;;  %s3703_s28 = int_to_ptr.vmem [resolvable:$true] %s140_s28 }
  0xa1   :  { %s3318_s23 = scalar_lea.hbm %s4043_s9, 64 }
  0xa2   :  { %p3319_p8 = scmp.ne.s32.totalorder %s4043_s9, %s3318_s23  ;;  %p3322_p9 = scmp.lt.u32.totalorder %s3318_s23, %s4043_s9 }
  0xa4   :  { %p3324_p10 = pnand %p3322_p9, %p3319_p8 }
  0xa6   :  { %3327 = shalt.err (!%p3324_p10)
}
  0xa7   :  { %s3328_s7 = scalar_lea.vmem %s117_s26, 64  ;;  %p3333_p12 = scmp.lt.s32.totalorder %s117_s26, %s117_s26 }
  0xa8   :  { %p3329_p11 = scmp.ne.s32.totalorder %s117_s26, %s3328_s7  ;;  %p3334_p13 = scmp.lt.s32.totalorder %s3328_s7, %s3328_s7 }
  0xaa   :  { %p3335_p0 = por %p3334_p13, %p3333_p12 }
  0xac   :  { %p3336_p1 = pnand %p3335_p0, %p3329_p11 }
  0xae   :  { %3339 = shalt.err (!%p3336_p1)
}
  0xaf   :  { %122 = dma.hbm_to_vmem [thread:$0]  %s4043_s9, 64, %s117_s26, [#allocation13], %s4071_s13, %s4071_s13, %s4070_s4  }
  0xb0   :  { %s3340_s6 = scalar_lea.hbm %s4046_s12, 1024 }
  0xb1   :  { %p3341_p2 = scmp.ne.s32.totalorder %s4046_s12, %s3340_s6  ;;  %p3344_p3 = scmp.lt.u32.totalorder %s3340_s6, %s4046_s12 }
  0xb3   :  { %p3346_p4 = pnand %p3344_p3, %p3341_p2 }
  0xb5   :  { %3349 = shalt.err (!%p3346_p4)
}
  0xb6   :  { %s3350_s22 = scalar_lea.vmem %s3703_s28, 1024  ;;  %p3355_p6 = scmp.lt.s32.totalorder %s3703_s28, %s3703_s28 }
  0xb7   :  { %p3351_p5 = scmp.ne.s32.totalorder %s3703_s28, %s3350_s22  ;;  %p3356_p7 = scmp.lt.s32.totalorder %s3350_s22, %s3350_s22 }
  0xb9   :  { %p3357_p8 = por %p3356_p7, %p3355_p6 }
  0xbb   :  { %p3358_p9 = pnand %p3357_p8, %p3351_p5 }
  0xbd   :  { %3361 = shalt.err (!%p3358_p9)
}
  0xbe   :  { %146 = dma.hbm_to_vmem [thread:$0]  %s4046_s12, 1024, %s3703_s28, [#allocation16], %s3462_s30, %s3462_s30, %s3463_s1  }
  0xbf   :  { %s3474_s13 = smov [#allocation20]   ;;  %s3475_s23 = smov [#allocation21]  }
  0xc0   :  { %s163_s26 = sshll.u32 %s3474_s13, 4  ;;  %s173_s19 = sshll.u32 %s3475_s23, 4  ;;  %s164_s26 = int_to_ptr.vmem [resolvable:$true] %s163_s26  ;;  %s174_s19 = int_to_ptr.vmem [resolvable:$true] %s173_s19 }
  0xc1   :  { %s3362_s8 = scalar_lea.hbm %s4048_s14, 16 }
  0xc2   :  { %p3363_p10 = scmp.ne.s32.totalorder %s4048_s14, %s3362_s8  ;;  %p3366_p11 = scmp.lt.u32.totalorder %s3362_s8, %s4048_s14 }
  0xc4   :  { %p3368_p12 = pnand %p3366_p11, %p3363_p10 }
  0xc6   :  { %3371 = shalt.err (!%p3368_p12)
}
  0xc7   :  { %s3372_s12 = scalar_lea.vmem %s164_s26, 16  ;;  %s3376_s30 = scalar_lea.vmem %s164_s26, 32 }
  0xc8   :  { %p3373_p13 = scmp.ne.s32.totalorder %s164_s26, %s3372_s12  ;;  %p3377_p0 = scmp.lt.s32.totalorder %s164_s26, %s164_s26 }
  0xc9   :  { %p3378_p1 = scmp.lt.s32.totalorder %s3376_s30, %s3372_s12 }
  0xcb   :  { %p3379_p2 = por %p3378_p1, %p3377_p0 }
  0xcd   :  { %p3380_p3 = pnand %p3379_p2, %p3373_p13 }
  0xcf   :  { %3383 = shalt.err (!%p3380_p3)
}
  0xd0   :  { %166 = dma.hbm_to_vmem [thread:$0]  %s4048_s14, 16, %s164_s26, [#allocation19]  }
  0xd1   :  { %s3384_s2 = scalar_lea.hbm %s4049_s15, 16 }
  0xd2   :  { %p3385_p4 = scmp.ne.s32.totalorder %s4049_s15, %s3384_s2  ;;  %p3388_p5 = scmp.lt.u32.totalorder %s3384_s2, %s4049_s15 }
  0xd4   :  { %p3390_p6 = pnand %p3388_p5, %p3385_p4 }
  0xd6   :  { %3393 = shalt.err (!%p3390_p6)
}
  0xd7   :  { %s3394_s9 = scalar_lea.vmem %s174_s19, 16  ;;  %s3398_s4 = scalar_lea.vmem %s174_s19, 32 }
  0xd8   :  { %p3395_p7 = scmp.ne.s32.totalorder %s174_s19, %s3394_s9  ;;  %p3399_p8 = scmp.lt.s32.totalorder %s174_s19, %s174_s19 }
  0xd9   :  { %p3400_p9 = scmp.lt.s32.totalorder %s3398_s4, %s3394_s9 }
  0xdb   :  { %p3401_p10 = por %p3400_p9, %p3399_p8 }
  0xdd   :  { %p3402_p11 = pnand %p3401_p10, %p3395_p7 }
  0xdf   :  { %3405 = shalt.err (!%p3402_p11)
}
  0xe0   :  { %176 = dma.hbm_to_vmem [thread:$0]  %s4049_s15, 16, %s174_s19, [#allocation22]  }
  0xe1   :  { %s187_s11 = sshll.u32 %s4052_s18, 4  ;;  %s188_s11 = int_to_ptr.vmem [resolvable:$true] %s187_s11 }
  0xe2   :  { %s3406_s24 = scalar_lea.vmem %s188_s11, 16  ;;  %p3411_p13 = scmp.lt.s32.totalorder %s188_s11, %s188_s11 }
  0xe3   :  { %p3407_p12 = scmp.ne.s32.totalorder %s188_s11, %s3406_s24  ;;  %p3412_p0 = scmp.lt.s32.totalorder %s3406_s24, %s3406_s24 }
  0xe5   :  { %p3413_p1 = por %p3412_p0, %p3411_p13 }
  0xe7   :  { %p3414_p2 = pnand %p3413_p1, %p3407_p12 }
  0xe9   :  { %3417 = shalt.err (!%p3414_p2)
}
  0xea   :  { %s3476_s8 = smov [#allocation23]  }
  0xeb   :  { %190 = dma.vmem_to_smem %s188_s11, 16, %s3476_s8, [#allocation5]  }
  0xec   :  { %3440 = dma.done.wait [#allocation3], 256  }
  0xed   :  { %3441 = vsyncadd [#allocation3], 4294967040 }
  0xee   :  { %3442 = dma.done.wait [#allocation7], 8256  }
  0xef   :  { %3443 = vsyncadd [#allocation7], 4294959040 }
  0xf0   :  { %3444 = dma.done.wait [#allocation10], 4160  }
  0xf1   :  { %3445 = vsyncadd [#allocation10], 4294963136 }
  0xf2   :  { %3446 = dma.done.wait [#allocation13], 4160  }
  0xf3   :  { %3447 = vsyncadd [#allocation13], 4294963136 }
  0xf4   :  { %3448 = dma.done.wait [#allocation16], 1040  }
  0xf5   :  { %3449 = vsyncadd [#allocation16], 4294966256 }
  0xf6   :  { %3450 = dma.done.wait [#allocation19], 32  }
  0xf7   :  { %3451 = vsyncadd [#allocation19], 4294967264 }
  0xf8   :  { %3452 = dma.done.wait [#allocation22], 16  }
  0xf9   :  { %3453 = vsyncadd [#allocation22], 4294967280 }
  0xfa   :  { %3454 = dma.done.wait [#allocation5], 16  }
  0xfb   :  { %3455 = vsyncadd [#allocation5], 4294967280 }
  0xfc   :  { %230 = sfence }
  0xfd   :  { %v2950_v0 = vld [vmem:[#allocation8 + $0x4] ss:$8 sps:$4 sm:$0xff]   ;;  %v2952_v1 = vld [vmem:[#allocation8] ss:$8 sps:$4 sm:$0xff]   ;;  %v3477_v2 = vmov 0   ;;  %v3478_v3 = vmov 0.0   ;;  %v263_v42 = vlaneseq }
  0xfe   :  { %419 = vmatprep.mubr.bf16.mxu0 %v3477_v2  ;;  %2716 = vmatprep.subr.bf16.mxu1 %v3478_v3  ;;  %v2953_v4 = vld [vmem:[#allocation8 + $0x14] ss:$8 sps:$4 sm:$0xff]   ;;  %v2955_v5 = vld [vmem:[#allocation8 + $0x10] ss:$8 sps:$4 sm:$0xff]   ;;  %v2956_v6 = vld [vmem:[#allocation8 + $0x24] ss:$8 sps:$4 sm:$0xff]  }
  0xff   :  { %387 = vmatprep.subr.bf16.mxu0 %v2950_v0  ;;  %2939 = vset.pattern.permute.xlu0 %v3477_v2  ;;  %v2958_v7 = vld [vmem:[#allocation8 + $0x20] ss:$8 sps:$4 sm:$0xff]   ;;  %v2959_v8 = vld [vmem:[#allocation8 + $0x34] ss:$8 sps:$4 sm:$0xff]   ;;  %v3770_v9 = vld [vmem:[#allocation2] sm:$0xff]  ;;  %v3784_v47 = vshrl.u32 %v263_v42, 7 }
 0x100   :  { %388 = vmatpush1.bf16.msra.mxu0 %v2952_v1  ;;  %v2961_v10 = vld [vmem:[#allocation8 + $0x30] ss:$8 sps:$4 sm:$0xff]   ;;  %v2962_v11 = vld [vmem:[#allocation8 + $0x44] ss:$8 sps:$4 sm:$0xff]   ;;  %v245_v13 = vmul.f32 %v3770_v9, %v3770_v9  ;;  %v2964_v17 = vld [vmem:[#allocation8 + $0x40] ss:$8 sps:$4 sm:$0xff]  }
 0x101   :  { %389 = vmatprep.subr.bf16.mxu0 %v2953_v4  ;;  %v3772_v12 = vld [vmem:[#allocation2 + $0x8] sm:$0xff]  ;;  %v2974_v16 = vld [vmem:[#allocation9] sm:$0xff]   ;;  %v2975_v20 = vld [vmem:[#allocation9 + $0x8] sm:$0xff]   ;;  %s4072_s19 = sld [smem:[#allocation36_spill]]  ;;  %v3793_v50 = vsub.s32 0, %v3784_v47  ;;  %vm3479_vm0 = vmmov 0  }
 0x102   :  { %v236_v14 = vadd.f32 %v3772_v12, %v3770_v9  ;;  %v246_v15 = vmul.f32 %v3772_v12, %v3772_v12  ;;  %2717 = vmatpush3.bf16.msra.mxu1 %v2974_v16  ;;  %v2965_v21 = vld [vmem:[#allocation8 + $0x54] ss:$8 sps:$4 sm:$0xff]   ;;  %v2967_v24 = vld [vmem:[#allocation8 + $0x50] ss:$8 sps:$4 sm:$0xff]   ;;  %v2968_v25 = vld [vmem:[#allocation8 + $0x64] ss:$8 sps:$4 sm:$0xff]   ;;  %2732 = vmatprep.mubr.msk.bf16.mxu1 %vm3479_vm0, %v3478_v3 }
 0x103   :  { %2718 = vmatprep.subr.bf16.mxu1 %v3478_v3  ;;  %v2976_v28 = vld [vmem:[#allocation9 + $0x10] sm:$0xff]   ;;  %v2977_v31 = vld [vmem:[#allocation9 + $0x18] sm:$0xff]   ;;  %v2970_v32 = vld [vmem:[#allocation8 + $0x60] ss:$8 sps:$4 sm:$0xff]   ;;  %s430_s7 = sld [smem:[#allocation23]]  ;;  %s2476_s20 = sld [smem:[#allocation23 + $0x1]] }
 0x104   :  { %390 = vmatpush1.bf16.msra.mxu0 %v2955_v5  ;;  %v237_v18 = vrot.slane %v236_v14, 4  ;;  %v247_v19 = vadd.f32 %v246_v15, %v245_v13  ;;  %v2971_v33 = vld [vmem:[#allocation8 + $0x74] ss:$8 sps:$4 sm:$0xff]   ;;  %v2978_v38 = vld [vmem:[#allocation9 + $0x20] sm:$0xff]   ;;  %v2973_v39 = vld [vmem:[#allocation8 + $0x70] ss:$8 sps:$4 sm:$0xff]  }
 0x105   :  { %391 = vmatprep.subr.bf16.mxu0 %v2956_v6  ;;  %v2979_v45 = vld [vmem:[#allocation9 + $0x28] sm:$0xff]   ;;  %v235_v52 = vld [vmem:[#allocation6] sm:$0x1]  ;;  %v2980_v63 = vld [vmem:[#allocation9 + $0x30] sm:$0xff]   ;;  %s2486_s12 = sld [smem:[#allocation23 + $0x2]]  ;;  %s2505_s28 = sld [smem:[#allocation23 + $0x3]] }
 0x106   :  { %v238_v22 = vadd.f32 %v237_v18, %v236_v14  ;;  %v248_v23 = vrot.slane %v247_v19, 4  ;;  %2719 = vmatpush3.bf16.msra.mxu1 %v2975_v20  ;;  %v2981_v0 = vld [vmem:[#allocation9 + $0x38] sm:$0xff]   ;;  %v2982_v1 = vld [vmem:[#allocation12] sm:$0xff]   ;;  %v2983_v4 = vld [vmem:[#allocation12 + $0x8] sm:$0xff]   ;;  %s2515_s2 = sld [smem:[#allocation23 + $0x4]]  ;;  %s2525_s0 = sld [smem:[#allocation23 + $0x5]] }
 0x107   :  { %2720 = vmatprep.subr.bf16.mxu1 %v3478_v3  ;;  %v234_v49 = vld [vmem:[%s4072_s19] sm:$0x1]  ;;  %v2984_v5 = vld [vmem:[#allocation12 + $0x10] sm:$0xff]   ;;  %v2985_v6 = vld [vmem:[#allocation12 + $0x18] sm:$0xff]   ;;  %s2544_s22 = sld [smem:[#allocation23 + $0x6]]  ;;  %s2554_s14 = sld [smem:[#allocation23 + $0x7]] }
 0x108   :  { %392 = vmatpush1.bf16.msra.mxu0 %v2958_v7  ;;  %v239_v26 = vrot.slane %v238_v22, 2  ;;  %v249_v27 = vadd.f32 %v248_v23, %v247_v19  ;;  %v2986_v7 = vld [vmem:[#allocation12 + $0x20] sm:$0xff]   ;;  %v2988_v23 = vld [vmem:[#allocation12 + $0x30] sm:$0xff]   ;;  %s2564_s13 = sld [smem:[#allocation23 + $0x8]]  ;;  %s2583_s11 = sld [smem:[#allocation23 + $0x9]] }
 0x109   :  { %393 = vmatprep.subr.bf16.mxu0 %v2959_v8  ;;  %v2987_v8 = vld [vmem:[#allocation12 + $0x28] sm:$0xff]   ;;  %s4073_s18 = sld [smem:[#allocation34_spill]]  ;;  %s2593_s25 = sld [smem:[#allocation23 + $0xa]] }
 0x10a   :  { %v240_v29 = vadd.f32 %v239_v26, %v238_v22  ;;  %v250_v30 = vrot.slane %v249_v27, 2  ;;  %2721 = vmatpush3.bf16.msra.mxu1 %v2976_v28  ;;  %v2998_v42 = vld [vmem:[#allocation8 + $0xa4] ss:$8 sps:$4 sm:$0xff]   ;;  %s2603_s21 = sld [smem:[#allocation23 + $0xb]] }
 0x10b   :  { %2722 = vmatprep.subr.bf16.mxu1 %v3478_v3 }
 0x10c   :  { %394 = vmatpush1.bf16.msra.mxu0 %v2961_v10  ;;  %v241_v34 = vrot.slane %v240_v29, 1  ;;  %v251_v35 = vadd.f32 %v250_v30, %v249_v27  ;;  %v554_v27 = vstv %s2476_s20 }
 0x10d   :  { %395 = vmatprep.subr.bf16.mxu0 %v2962_v11 }
 0x10e   :  { %v242_v36 = vadd.f32 %v241_v34, %v240_v29  ;;  %v252_v37 = vrot.slane %v251_v35, 1  ;;  %2723 = vmatpush3.bf16.msra.mxu1 %v2977_v31 }
 0x10f   :  { %2724 = vmatprep.subr.bf16.mxu1 %v3478_v3 }
 0x110   :  { %396 = vmatpush1.bf16.msra.mxu0 %v2964_v17  ;;  %v244_v40 = vmul.f32 0.0625, %v242_v36  ;;  %v253_v41 = vadd.f32 %v252_v37, %v251_v35 }
 0x111   :  { %397 = vmatprep.subr.bf16.mxu0 %v2965_v21 }
 0x112   :  { %v254_v43 = vmul.f32 0.0625, %v253_v41  ;;  %v255_v44 = vmul.f32 %v244_v40, %v244_v40  ;;  %2725 = vmatpush3.bf16.msra.mxu1 %v2978_v38  ;;  %v2992_v38 = vld [vmem:[#allocation8 + $0x84] ss:$8 sps:$4 sm:$0xff]   ;;  %v2993_v41 = vld [vmem:[#allocation8 + $0x90] ss:$8 sps:$4 sm:$0xff]  }
 0x113   :  { %2726 = vmatprep.subr.bf16.mxu1 %v3478_v3 }
 0x114   :  { %398 = vmatpush1.bf16.msra.mxu0 %v2967_v24  ;;  %v256_v46 = vsub.f32 %v254_v43, %v255_v44  ;;  %v2989_v24 = vld [vmem:[#allocation12 + $0x38] sm:$0xff]  }
 0x115   :  { %399 = vmatprep.subr.bf16.mxu0 %v2968_v25  ;;  %v2467_v25 = vld [vmem:[#allocation11] ss:$0 sm:$0xff]  ;;  %v3001_v44 = vld [vmem:[#allocation8 + $0xb4] ss:$8 sps:$4 sm:$0xff]  }
 0x116   :  { %v257_v48 = vadd.f32 1e-05, %v256_v46  ;;  %2727 = vmatpush3.bf16.msra.mxu1 %v2979_v45  ;;  %v2996_v43 = vld [vmem:[#allocation8 + $0xa0] ss:$8 sps:$4 sm:$0xff]   ;;  %v2999_v45 = vld [vmem:[#allocation8 + $0xb0] ss:$8 sps:$4 sm:$0xff]  }
 0x117   :  { %2728 = vmatprep.subr.bf16.mxu1 %v3478_v3  ;;  %v3004_v46 = vld [vmem:[#allocation8 + $0xc4] ss:$8 sps:$4 sm:$0xff]  }
 0x118   :  { %400 = vmatpush1.bf16.msra.mxu0 %v2970_v32  ;;  %3126 = vrsqrt.f32 %v257_v48  ;;  %v3002_v48 = vld [vmem:[#allocation8 + $0xc0] ss:$8 sps:$4 sm:$0xff]  }
 0x119   :  { %401 = vmatprep.subr.bf16.mxu0 %v2971_v33 }
 0x11a   :  { %2729 = vmatpush3.bf16.msra.mxu1 %v2980_v63  ;;  %v2477_v63 = vld [vmem:[#allocation14] ss:$0 sm:$0xff] }
 0x11b   :  { %2730 = vmatprep.subr.bf16.mxu1 %v3478_v3 }
 0x11c   :  { %402 = vmatpush1.bf16.msra.mxu0 %v2973_v39  ;;  %v2990_v39 = vld [vmem:[#allocation8 + $0x80] ss:$8 sps:$4 sm:$0xff]  }
 0x11d   :  { %2736 = vmatprep.subr.bf16.mxu0 %v3478_v3 }
 0x11e   :  { %2731 = vmatpush3.bf16.msra.mxu1 %v2981_v0 }
 0x11f   :  { %840 = vmatprep.subr.bf16.mxu1 %v2992_v38 }
 0x122   :  { %v3127_v51 = vpop.eup %3126 }
 0x123   :  { %v259_v53 = vmul.f32 %v3127_v51, %v234_v49  ;;  %v3007_v49 = vld [vmem:[#allocation8 + $0xd4] ss:$8 sps:$4 sm:$0xff]   ;;  %v3005_v51 = vld [vmem:[#allocation8 + $0xd0] ss:$8 sps:$4 sm:$0xff]  }
 0x125   :  { %v260_v54 = vmul.f32 %v259_v53, %v244_v40  ;;  %v266_v55 = vrot.slane %v259_v53, %v3793_v50  ;;  %v2995_v40 = vld [vmem:[#allocation8 + $0x94] ss:$8 sps:$4 sm:$0xff]   ;;  %v3008_v53 = vld [vmem:[#allocation8 + $0xe0] ss:$8 sps:$4 sm:$0xff]  }
 0x127   :  { %v261_v56 = vsub.f32 %v235_v52, %v260_v54  ;;  %v268_v57 = vmul.f32 %v266_v55, %v3770_v9  ;;  %v269_v58 = vmul.f32 %v266_v55, %v3772_v12  ;;  %v3813_v9 = vld [vmem:[%s4039_s5] sm:$0x3]  ;;  %v433_v12 = vstv %s430_s7  ;;  %v3013_v54 = vld [vmem:[#allocation8 + $0xf4] ss:$8 sps:$4 sm:$0xff]   ;;  %v3011_v55 = vld [vmem:[#allocation8 + $0xf0] ss:$8 sps:$4 sm:$0xff]  }
 0x128   :  { %v300_v10 = vrot.slane %v3813_v9, %v3793_v50  ;;  %v3010_v52 = vld [vmem:[#allocation8 + $0xe4] ss:$8 sps:$4 sm:$0xff]  }
 0x129   :  { %v274_v59 = vrot.slane %v261_v56, %v3793_v50  ;;  %v3014_v56 = vld [vmem:[#allocation9 + $0x40] sm:$0xff]  }
 0x12b   :  { %v276_v60 = vadd.f32 %v274_v59, %v268_v57  ;;  %v277_v61 = vadd.f32 %v274_v59, %v269_v58  ;;  %v3015_v57 = vld [vmem:[#allocation9 + $0x48] sm:$0xff]   ;;  %v3016_v58 = vld [vmem:[#allocation9 + $0x50] sm:$0xff]   ;;  %v3017_v59 = vld [vmem:[#allocation9 + $0x58] sm:$0xff]  }
 0x12d   :  { %v294_v62 = vpack.c.bf16 %v277_v61, %v276_v60  ;;  %v3018_v60 = vld [vmem:[#allocation9 + $0x60] sm:$0xff]   ;;  %v3019_v61 = vld [vmem:[#allocation9 + $0x68] sm:$0xff]  }
 0x12f   :  { %420 = vmatmul.mubr.bf16.vlgmr.msra.gmra.mrb[0].mxu0 %v294_v62  ;;  %v3834_v62 = vsub.s32 1, %v3784_v47 }
 0x130   :  { %2752 = vmatprep.mubr.msk.bf16.mxu0 %vm3479_vm0, %v3478_v3  ;;  %2737 = vmatpush3.bf16.msra.mxu0 %v2982_v1 }
 0x131   :  { %2738 = vmatprep.subr.bf16.mxu0 %v3478_v3  ;;  %v304_v0 = vrot.slane %v3813_v9, %v3834_v62 }
 0x134   :  { %2739 = vmatpush3.bf16.msra.mxu0 %v2983_v4  ;;  %v675_v4 = vstv %s2486_s12 }
 0x135   :  { %2740 = vmatprep.subr.bf16.mxu0 %v3478_v3 }
 0x138   :  { %2741 = vmatpush3.bf16.msra.mxu0 %v2984_v5 }
 0x139   :  { %2742 = vmatprep.subr.bf16.mxu0 %v3478_v3 }
 0x13c   :  { %2743 = vmatpush3.bf16.msra.mxu0 %v2985_v6 }
 0x13d   :  { %2744 = vmatprep.subr.bf16.mxu0 %v3478_v3 }
 0x140   :  { %2745 = vmatpush3.bf16.msra.mxu0 %v2986_v7 }
 0x141   :  { %2746 = vmatprep.subr.bf16.mxu0 %v3478_v3 }
 0x144   :  { %2747 = vmatpush3.bf16.msra.mxu0 %v2987_v8 }
 0x145   :  { %2748 = vmatprep.subr.bf16.mxu0 %v3478_v3 }
 0x148   :  { %2749 = vmatpush3.bf16.msra.mxu0 %v2988_v23 }
 0x149   :  { %2750 = vmatprep.subr.bf16.mxu0 %v3478_v3 }
 0x14c   :  { %2751 = vmatpush3.bf16.msra.mxu0 %v2989_v24 }
 0x14d   :  { %2756 = vmatprep.subr.bf16.mxu0 %v3478_v3 }
 0x202   :  { %v421_v11 = vpop.f32.mrb[0].mxu0 }
 0x203   :  { %v422_v13 = vadd.f32 %v421_v11, %v300_v10  ;;  %v3817_v14 = vpop.f32.mrb[1].mxu0 }
 0x204   :  { %v425_v15 = vpop.f32.mrb[2].mxu0 }
 0x205   :  { %v434_v16 = vmul.f32 %v433_v12, %v422_v13  ;;  %v426_v17 = vadd.f32 %v425_v15, %v300_v10  ;;  %v3819_v18 = vpop.f32.mrb[3].mxu0  ;;  %vm431_vm1 = vcmp.ge.f32.partialorder %v422_v13, 0.0 }
 0x206   :  { %v428_v47 = vadd.f32 %v3819_v18, %v304_v0 }
 0x207   :  { %vm432_vm2 = vcmp.ge.f32.partialorder %v426_v17, 0.0  ;;  %v435_v19 = vmul.f32 %v433_v12, %v426_v17  ;;  %v436_v20 = vsel %vm431_vm1, %v422_v13, %v434_v16  ;;  %v424_v12 = vadd.f32 %v3817_v14, %v304_v0  ;;  %v3857_v0 = vld [vmem:[%s4039_s5 + $0x2] sm:$0x3] }
 0x209   :  { %v437_v21 = vsel %vm432_vm2, %v426_v17, %v435_v19 }
 0x20a   :  { %v454_v22 = vpack.c.bf16 %v437_v21, %v436_v20 }
 0x20c   :  { %2733 = vmatmul.mubr.bf16.vlgmr.msra.gmra.mrb[0].mxu1 %v454_v22 }
 0x20d   :  { %872 = vmatprep.mubr.bf16.mxu1 %v3477_v2  ;;  %841 = vmatpush1.bf16.msra.mxu1 %v2990_v39 }
 0x20e   :  { %842 = vmatprep.subr.bf16.mxu1 %v2995_v40  ;;  %v2487_v40 = vld [vmem:[%s4072_s19 + $0x1] sm:$0x1] }
 0x211   :  { %843 = vmatpush1.bf16.msra.mxu1 %v2993_v41 }
 0x212   :  { %844 = vmatprep.subr.bf16.mxu1 %v2998_v42 }
 0x215   :  { %845 = vmatpush1.bf16.msra.mxu1 %v2996_v43  ;;  %v687_v43 = vld [vmem:[#allocation6 + $0x1] sm:$0x1] }
 0x216   :  { %846 = vmatprep.subr.bf16.mxu1 %v3001_v44 }
 0x219   :  { %847 = vmatpush1.bf16.msra.mxu1 %v2999_v45 }
 0x21a   :  { %848 = vmatprep.subr.bf16.mxu1 %v3004_v46 }
 0x21d   :  { %849 = vmatpush1.bf16.msra.mxu1 %v3002_v48 }
 0x21e   :  { %850 = vmatprep.subr.bf16.mxu1 %v3007_v49 }
 0x221   :  { %851 = vmatpush1.bf16.msra.mxu1 %v3005_v51 }
 0x222   :  { %852 = vmatprep.subr.bf16.mxu1 %v3010_v52 }
 0x225   :  { %853 = vmatpush1.bf16.msra.mxu1 %v3008_v53 }
 0x226   :  { %854 = vmatprep.subr.bf16.mxu1 %v3013_v54 }
 0x229   :  { %855 = vmatpush1.bf16.msra.mxu1 %v3011_v55  ;;  %v3020_v55 = vld [vmem:[#allocation9 + $0x70] sm:$0xff]  }
 0x22a   :  { %2776 = vmatprep.subr.bf16.mxu1 %v3478_v3 }
 0x2df   :  { %v544_v26 = vpop.f32.mrb[0].mxu1 }
 0x2e0   :  { %v545_v28 = vadd.f32 %v2467_v25, %v544_v26  ;;  %v2734_v29 = vpop.f32.mrb[1].mxu1 }
 0x2e1   :  { %v547_v30 = vpop.f32.mrb[2].mxu1 }
 0x2e2   :  { %v555_v31 = vmul.f32 %v554_v27, %v545_v28  ;;  %v548_v32 = vadd.f32 %v2467_v25, %v547_v30  ;;  %v2735_v33 = vpop.f32.mrb[3].mxu1  ;;  %vm552_vm3 = vcmp.ge.f32.partialorder %v545_v28, 0.0 }
 0x2e4   :  { %vm553_vm4 = vcmp.ge.f32.partialorder %v548_v32, 0.0  ;;  %v556_v34 = vmul.f32 %v554_v27, %v548_v32  ;;  %v557_v35 = vsel %vm552_vm3, %v545_v28, %v555_v31 }
 0x2e6   :  { %v558_v36 = vsel %vm553_vm4, %v548_v32, %v556_v34 }
 0x2e7   :  { %v575_v37 = vpack.c.bf16 %v558_v36, %v557_v35 }
 0x2e9   :  { %2753 = vmatmul.mubr.bf16.vlgmr.msra.gmra.mrb[4].mxu0 %v575_v37 }
 0x2ea   :  { %2772 = vmatprep.mubr.msk.bf16.mxu0 %vm3479_vm0, %v3478_v3  ;;  %2757 = vmatpush3.bf16.msra.mxu0 %v3014_v56  ;;  %v3021_v56 = vld [vmem:[#allocation9 + $0x78] sm:$0xff]  }
 0x2eb   :  { %2758 = vmatprep.subr.bf16.mxu0 %v3478_v3 }
 0x2ee   :  { %2759 = vmatpush3.bf16.msra.mxu0 %v3015_v57  ;;  %v3022_v57 = vld [vmem:[#allocation12 + $0x40] sm:$0xff]  }
 0x2ef   :  { %2760 = vmatprep.subr.bf16.mxu0 %v3478_v3 }
 0x2f2   :  { %2761 = vmatpush3.bf16.msra.mxu0 %v3016_v58  ;;  %v3023_v58 = vld [vmem:[#allocation12 + $0x48] sm:$0xff]  }
 0x2f3   :  { %2762 = vmatprep.subr.bf16.mxu0 %v3478_v3 }
 0x2f6   :  { %2763 = vmatpush3.bf16.msra.mxu0 %v3017_v59  ;;  %v3024_v59 = vld [vmem:[#allocation12 + $0x50] sm:$0xff]  }
 0x2f7   :  { %2764 = vmatprep.subr.bf16.mxu0 %v3478_v3 }
 0x2fa   :  { %2765 = vmatpush3.bf16.msra.mxu0 %v3018_v60  ;;  %v3025_v60 = vld [vmem:[#allocation12 + $0x58] sm:$0xff]  }
 0x2fb   :  { %2766 = vmatprep.subr.bf16.mxu0 %v3478_v3 }
 0x2fe   :  { %2767 = vmatpush3.bf16.msra.mxu0 %v3019_v61  ;;  %v3026_v61 = vld [vmem:[#allocation12 + $0x60] sm:$0xff]  }
 0x2ff   :  { %2768 = vmatprep.subr.bf16.mxu0 %v3478_v3 }
 0x302   :  { %2769 = vmatpush3.bf16.msra.mxu0 %v3020_v55  ;;  %v757_v55 = vrot.slane %v3857_v0, %v3834_v62 }
 0x303   :  { %2770 = vmatprep.subr.bf16.mxu0 %v3478_v3 }
 0x306   :  { %2771 = vmatpush3.bf16.msra.mxu0 %v3021_v56 }
 0x3bc   :  { %v665_v1 = vpop.f32.mrb[4].mxu0 }
 0x3bd   :  { %v666_v5 = vadd.f32 %v2477_v63, %v665_v1  ;;  %v2754_v6 = vpop.f32.mrb[5].mxu0  ;;  %v753_v1 = vrot.slane %v3857_v0, %v3793_v50 }
 0x3be   :  { %v668_v7 = vpop.f32.mrb[6].mxu0 }
 0x3bf   :  { %vm673_vm5 = vcmp.ge.f32.partialorder %v666_v5, 0.0  ;;  %v676_v8 = vmul.f32 %v675_v4, %v666_v5  ;;  %v669_v10 = vadd.f32 %v2477_v63, %v668_v7  ;;  %v2755_v11 = vpop.f32.mrb[7].mxu0  ;;  %v3027_v63 = vld [vmem:[#allocation12 + $0x68] sm:$0xff]  }
 0x3c1   :  { %v678_v13 = vsel %vm673_vm5, %v666_v5, %v676_v8  ;;  %vm674_vm6 = vcmp.ge.f32.partialorder %v669_v10, 0.0  ;;  %v677_v15 = vmul.f32 %v675_v4, %v669_v10  ;;  %v886_v5 = vstv %s2505_s28 }
 0x3c2   :  { %v680_v16 = vadd.f32 %v678_v13, %v424_v12 }
 0x3c3   :  { %v679_v17 = vsel %vm674_vm6, %v669_v10, %v677_v15 }
 0x3c4   :  { %v682_v19 = vmax.f32 %v680_v16, 0.0  ;;  %v681_v9 = vadd.f32 %v679_v17, %v428_v47  ;;  %v3028_v17 = vld [vmem:[#allocation12 + $0x70] sm:$0xff]  }
 0x3c6   :  { %v683_v20 = vmax.f32 %v681_v9, 0.0  ;;  %v696_v21 = vmul.f32 %v682_v19, %v682_v19  ;;  %v2506_v9 = vld [vmem:[#allocation11 + $0x1] ss:$0 sm:$0xff] }
 0x3c8   :  { %v688_v22 = vadd.f32 %v683_v20, %v682_v19  ;;  %v697_v23 = vmul.f32 %v683_v20, %v683_v20 }
 0x3ca   :  { %v689_v24 = vrot.slane %v688_v22, 4  ;;  %v698_v25 = vadd.f32 %v697_v23, %v696_v21  ;;  %v1009_v21 = vstv %s2515_s2 }
 0x3cc   :  { %v690_v26 = vadd.f32 %v689_v24, %v688_v22  ;;  %v699_v27 = vrot.slane %v698_v25, 4 }
 0x3ce   :  { %v691_v28 = vrot.slane %v690_v26, 2  ;;  %v700_v29 = vadd.f32 %v699_v27, %v698_v25 }
 0x3d0   :  { %v692_v14 = vadd.f32 %v691_v28, %v690_v26  ;;  %v701_v30 = vrot.slane %v700_v29, 2 }
 0x3d2   :  { %v693_v31 = vrot.slane %v692_v14, 1  ;;  %v702_v32 = vadd.f32 %v701_v30, %v700_v29 }
 0x3d4   :  { %v694_v33 = vadd.f32 %v693_v31, %v692_v14  ;;  %v703_v18 = vrot.slane %v702_v32, 1  ;;  %v3032_v31 = vld [vmem:[#allocation8 + $0x104] ss:$8 sps:$4 sm:$0xff]  }
 0x3d5   :  { %1297 = vmatprep.subr.bf16.mxu0 %v3032_v31 }
 0x3d6   :  { %v695_v34 = vmul.f32 0.0625, %v694_v33  ;;  %v704_v35 = vadd.f32 %v703_v18, %v702_v32  ;;  %v3030_v32 = vld [vmem:[#allocation8 + $0x100] ss:$8 sps:$4 sm:$0xff]   ;;  %v3035_v33 = vld [vmem:[#allocation8 + $0x114] ss:$8 sps:$4 sm:$0xff]  }
 0x3d7   :  { %v3033_v18 = vld [vmem:[#allocation8 + $0x110] ss:$8 sps:$4 sm:$0xff]  }
 0x3d8   :  { %v705_v36 = vmul.f32 0.0625, %v704_v35  ;;  %v706_v37 = vmul.f32 %v695_v34, %v695_v34  ;;  %v3036_v35 = vld [vmem:[#allocation8 + $0x120] ss:$8 sps:$4 sm:$0xff]  }
 0x3da   :  { %v707_v38 = vsub.f32 %v705_v36, %v706_v37  ;;  %v3041_v36 = vld [vmem:[#allocation8 + $0x134] ss:$8 sps:$4 sm:$0xff]   ;;  %v3039_v37 = vld [vmem:[#allocation8 + $0x130] ss:$8 sps:$4 sm:$0xff]  }
 0x3dc   :  { %v708_v39 = vadd.f32 1e-05, %v707_v38  ;;  %v3044_v38 = vld [vmem:[#allocation8 + $0x144] ss:$8 sps:$4 sm:$0xff]  }
 0x3de   :  { %3128 = vrsqrt.f32 %v708_v39  ;;  %v3042_v39 = vld [vmem:[#allocation8 + $0x140] ss:$8 sps:$4 sm:$0xff]  }
 0x3e8   :  { %v3129_v41 = vpop.eup %3128 }
 0x3e9   :  { %v710_v42 = vmul.f32 %v3129_v41, %v2487_v40  ;;  %v3047_v40 = vld [vmem:[#allocation8 + $0x154] ss:$8 sps:$4 sm:$0xff]   ;;  %v3045_v41 = vld [vmem:[#allocation8 + $0x150] ss:$8 sps:$4 sm:$0xff]  }
 0x3eb   :  { %v717_v44 = vrot.slane %v710_v42, %v3793_v50  ;;  %v711_v45 = vmul.f32 %v710_v42, %v695_v34  ;;  %v3038_v34 = vld [vmem:[#allocation8 + $0x124] ss:$8 sps:$4 sm:$0xff]  }
 0x3ec   :  { %v3050_v42 = vld [vmem:[#allocation8 + $0x164] ss:$8 sps:$4 sm:$0xff]  }
 0x3ed   :  { %v720_v46 = vmul.f32 %v717_v44, %v683_v20  ;;  %v712_v48 = vsub.f32 %v687_v43, %v711_v45  ;;  %v719_v49 = vmul.f32 %v717_v44, %v682_v19  ;;  %v3029_v19 = vld [vmem:[#allocation12 + $0x78] sm:$0xff]   ;;  %v3051_v45 = vld [vmem:[#allocation8 + $0x170] ss:$8 sps:$4 sm:$0xff]  }
 0x3ee   :  { %v3048_v43 = vld [vmem:[#allocation8 + $0x160] ss:$8 sps:$4 sm:$0xff]   ;;  %v3053_v44 = vld [vmem:[#allocation8 + $0x174] ss:$8 sps:$4 sm:$0xff]  }
 0x3ef   :  { %v725_v51 = vrot.slane %v712_v48, %v3793_v50  ;;  %v3055_v48 = vld [vmem:[#allocation9 + $0x88] sm:$0xff]  }
 0x3f1   :  { %v727_v52 = vadd.f32 %v725_v51, %v719_v49  ;;  %v728_v53 = vadd.f32 %v725_v51, %v720_v46  ;;  %v3054_v46 = vld [vmem:[#allocation9 + $0x80] sm:$0xff]   ;;  %v3056_v49 = vld [vmem:[#allocation9 + $0x90] sm:$0xff]   ;;  %v3057_v51 = vld [vmem:[#allocation9 + $0x98] sm:$0xff]  }
 0x3f3   :  { %v746_v54 = vpack.c.bf16 %v728_v53, %v727_v52  ;;  %v3058_v52 = vld [vmem:[#allocation9 + $0xa0] sm:$0xff]   ;;  %v3059_v53 = vld [vmem:[#allocation9 + $0xa8] sm:$0xff]  }
 0x3f5   :  { %873 = vmatmul.mubr.bf16.vlgmr.msra.gmra.mrb[4].mxu1 %v746_v54  ;;  %v2516_v54 = vld [vmem:[#allocation14 + $0x1] ss:$0 sm:$0xff] }
 0x3f6   :  { %2792 = vmatprep.mubr.msk.bf16.mxu1 %vm3479_vm0, %v3478_v3  ;;  %2777 = vmatpush3.bf16.msra.mxu1 %v3022_v57  ;;  %v1132_v57 = vstv %s2525_s0 }
 0x3f7   :  { %2778 = vmatprep.subr.bf16.mxu1 %v3478_v3 }
 0x3fa   :  { %2779 = vmatpush3.bf16.msra.mxu1 %v3023_v58 }
 0x3fb   :  { %2780 = vmatprep.subr.bf16.mxu1 %v3478_v3 }
 0x3fe   :  { %2781 = vmatpush3.bf16.msra.mxu1 %v3024_v59 }
 0x3ff   :  { %2782 = vmatprep.subr.bf16.mxu1 %v3478_v3 }
 0x402   :  { %2783 = vmatpush3.bf16.msra.mxu1 %v3025_v60 }
 0x403   :  { %2784 = vmatprep.subr.bf16.mxu1 %v3478_v3 }
 0x406   :  { %2785 = vmatpush3.bf16.msra.mxu1 %v3026_v61 }
 0x407   :  { %2786 = vmatprep.subr.bf16.mxu1 %v3478_v3 }
 0x40a   :  { %2787 = vmatpush3.bf16.msra.mxu1 %v3027_v63 }
 0x40b   :  { %2788 = vmatprep.subr.bf16.mxu1 %v3478_v3 }
 0x40e   :  { %2789 = vmatpush3.bf16.msra.mxu1 %v3028_v17 }
 0x40f   :  { %2790 = vmatprep.subr.bf16.mxu1 %v3478_v3 }
 0x412   :  { %2791 = vmatpush3.bf16.msra.mxu1 %v3029_v19 }
 0x413   :  { %2796 = vmatprep.subr.bf16.mxu1 %v3478_v3 }
 0x4c8   :  { %v874_v4 = vpop.f32.mrb[4].mxu1 }
 0x4c9   :  { %v875_v6 = vadd.f32 %v874_v4, %v753_v1  ;;  %v3861_v7 = vpop.f32.mrb[5].mxu1 }
 0x4ca   :  { %v878_v8 = vpop.f32.mrb[6].mxu1  ;;  %v877_v4 = vadd.f32 %v3861_v7, %v757_v55 }
 0x4cb   :  { %v887_v10 = vmul.f32 %v886_v5, %v875_v6  ;;  %v879_v11 = vadd.f32 %v878_v8, %v753_v1  ;;  %v3863_v12 = vpop.f32.mrb[7].mxu1  ;;  %vm884_vm7 = vcmp.ge.f32.partialorder %v875_v6, 0.0 }
 0x4cc   :  { %v881_v8 = vadd.f32 %v3863_v12, %v757_v55  ;;  %v3898_v55 = vld [vmem:[%s4039_s5 + $0x4] sm:$0x3] }
 0x4cd   :  { %vm885_vm8 = vcmp.ge.f32.partialorder %v879_v11, 0.0  ;;  %v888_v13 = vmul.f32 %v886_v5, %v879_v11  ;;  %v889_v15 = vsel %vm884_vm7, %v875_v6, %v887_v10 }
 0x4cf   :  { %v890_v47 = vsel %vm885_vm8, %v879_v11, %v888_v13 }
 0x4d0   :  { %v908_v16 = vpack.c.bf16 %v890_v47, %v889_v15 }
 0x4d2   :  { %2773 = vmatmul.mubr.bf16.vlgmr.msra.gmra.mrb[8].mxu0 %v908_v16 }
 0x4d3   :  { %1329 = vmatprep.mubr.bf16.mxu0 %v3477_v2  ;;  %1298 = vmatpush1.bf16.msra.mxu0 %v3030_v32 }
 0x4d4   :  { %1299 = vmatprep.subr.bf16.mxu0 %v3035_v33  ;;  %v2526_v33 = vld [vmem:[%s4072_s19 + $0x2] sm:$0x1] }
 0x4d7   :  { %1300 = vmatpush1.bf16.msra.mxu0 %v3033_v18 }
 0x4d8   :  { %1301 = vmatprep.subr.bf16.mxu0 %v3038_v34 }
 0x4db   :  { %1302 = vmatpush1.bf16.msra.mxu0 %v3036_v35  ;;  %v1144_v35 = vld [vmem:[#allocation6 + $0x2] sm:$0x1] }
 0x4dc   :  { %1303 = vmatprep.subr.bf16.mxu0 %v3041_v36 }
 0x4df   :  { %1304 = vmatpush1.bf16.msra.mxu0 %v3039_v37 }
 0x4e0   :  { %1305 = vmatprep.subr.bf16.mxu0 %v3044_v38 }
 0x4e3   :  { %1306 = vmatpush1.bf16.msra.mxu0 %v3042_v39 }
 0x4e4   :  { %1307 = vmatprep.subr.bf16.mxu0 %v3047_v40 }
 0x4e7   :  { %1308 = vmatpush1.bf16.msra.mxu0 %v3045_v41 }
 0x4e8   :  { %1309 = vmatprep.subr.bf16.mxu0 %v3050_v42 }
 0x4eb   :  { %1310 = vmatpush1.bf16.msra.mxu0 %v3048_v43 }
 0x4ec   :  { %1311 = vmatprep.subr.bf16.mxu0 %v3053_v44 }
 0x4ef   :  { %1312 = vmatpush1.bf16.msra.mxu0 %v3051_v45  ;;  %v3060_v45 = vld [vmem:[#allocation9 + $0xb0] sm:$0xff]  }
 0x4f0   :  { %2816 = vmatprep.subr.bf16.mxu0 %v3478_v3 }
 0x5a5   :  { %v999_v20 = vpop.f32.mrb[8].mxu0 }
 0x5a6   :  { %v1000_v22 = vadd.f32 %v2506_v9, %v999_v20  ;;  %v2774_v23 = vpop.f32.mrb[9].mxu0 }
 0x5a7   :  { %v1002_v24 = vpop.f32.mrb[10].mxu0 }
 0x5a8   :  { %v1010_v25 = vmul.f32 %v1009_v21, %v1000_v22  ;;  %v1003_v26 = vadd.f32 %v2506_v9, %v1002_v24  ;;  %v2775_v27 = vpop.f32.mrb[11].mxu0  ;;  %vm1007_vm9 = vcmp.ge.f32.partialorder %v1000_v22, 0.0 }
 0x5aa   :  { %vm1008_vm10 = vcmp.ge.f32.partialorder %v1003_v26, 0.0  ;;  %v1011_v28 = vmul.f32 %v1009_v21, %v1003_v26  ;;  %v1012_v29 = vsel %vm1007_vm9, %v1000_v22, %v1010_v25 }
 0x5ac   :  { %v1013_v14 = vsel %vm1008_vm10, %v1003_v26, %v1011_v28 }
 0x5ad   :  { %v1031_v30 = vpack.c.bf16 %v1013_v14, %v1012_v29 }
 0x5af   :  { %2793 = vmatmul.mubr.bf16.vlgmr.msra.gmra.mrb[8].mxu1 %v1031_v30 }
 0x5b0   :  { %2812 = vmatprep.mubr.msk.bf16.mxu1 %vm3479_vm0, %v3478_v3  ;;  %2797 = vmatpush3.bf16.msra.mxu1 %v3054_v46  ;;  %v3061_v46 = vld [vmem:[#allocation9 + $0xb8] sm:$0xff]  }
 0x5b1   :  { %2798 = vmatprep.subr.bf16.mxu1 %v3478_v3 }
 0x5b4   :  { %2799 = vmatpush3.bf16.msra.mxu1 %v3055_v48  ;;  %v3062_v48 = vld [vmem:[#allocation12 + $0x80] sm:$0xff]  }
 0x5b5   :  { %2800 = vmatprep.subr.bf16.mxu1 %v3478_v3 }
 0x5b8   :  { %2801 = vmatpush3.bf16.msra.mxu1 %v3056_v49  ;;  %v3063_v49 = vld [vmem:[#allocation12 + $0x88] sm:$0xff]  }
 0x5b9   :  { %2802 = vmatprep.subr.bf16.mxu1 %v3478_v3 }
 0x5bc   :  { %2803 = vmatpush3.bf16.msra.mxu1 %v3057_v51  ;;  %v3064_v51 = vld [vmem:[#allocation12 + $0x90] sm:$0xff]  }
 0x5bd   :  { %2804 = vmatprep.subr.bf16.mxu1 %v3478_v3 }
 0x5c0   :  { %2805 = vmatpush3.bf16.msra.mxu1 %v3058_v52  ;;  %v3065_v52 = vld [vmem:[#allocation12 + $0x98] sm:$0xff]  }
 0x5c1   :  { %2806 = vmatprep.subr.bf16.mxu1 %v3478_v3 }
 0x5c4   :  { %2807 = vmatpush3.bf16.msra.mxu1 %v3059_v53  ;;  %v3066_v53 = vld [vmem:[#allocation12 + $0xa0] sm:$0xff]  }
 0x5c5   :  { %2808 = vmatprep.subr.bf16.mxu1 %v3478_v3 }
 0x5c8   :  { %2809 = vmatpush3.bf16.msra.mxu1 %v3060_v45 }
 0x5c9   :  { %2810 = vmatprep.subr.bf16.mxu1 %v3478_v3 }
 0x5cc   :  { %2811 = vmatpush3.bf16.msra.mxu1 %v3061_v46  ;;  %v1589_v46 = vstv %s2564_s13 }
 0x682   :  { %v1122_v56 = vpop.f32.mrb[8].mxu1 }
 0x683   :  { %v1123_v58 = vadd.f32 %v2516_v54, %v1122_v56  ;;  %v2794_v59 = vpop.f32.mrb[9].mxu1  ;;  %v1210_v56 = vrot.slane %v3898_v55, %v3793_v50 }
 0x684   :  { %v1125_v60 = vpop.f32.mrb[10].mxu1 }
 0x685   :  { %vm1130_vm11 = vcmp.ge.f32.partialorder %v1123_v58, 0.0  ;;  %v1133_v61 = vmul.f32 %v1132_v57, %v1123_v58  ;;  %v1126_v63 = vadd.f32 %v2516_v54, %v1125_v60  ;;  %v2795_v1 = vpop.f32.mrb[11].mxu1  ;;  %v3067_v54 = vld [vmem:[#allocation12 + $0xa8] sm:$0xff]  }
 0x687   :  { %v1135_v5 = vsel %vm1130_vm11, %v1123_v58, %v1133_v61  ;;  %vm1131_vm12 = vcmp.ge.f32.partialorder %v1126_v63, 0.0  ;;  %v1134_v6 = vmul.f32 %v1132_v57, %v1126_v63  ;;  %v1343_v58 = vstv %s2544_s22 }
 0x688   :  { %v1137_v10 = vadd.f32 %v1135_v5, %v877_v4 }
 0x689   :  { %v1136_v11 = vsel %vm1131_vm12, %v1126_v63, %v1134_v6 }
 0x68a   :  { %v1139_v13 = vmax.f32 %v1137_v10, 0.0  ;;  %v1138_v0 = vadd.f32 %v1136_v11, %v881_v8  ;;  %v3068_v11 = vld [vmem:[#allocation12 + $0xb0] sm:$0xff]  }
 0x68c   :  { %v1140_v15 = vmax.f32 %v1138_v0, 0.0  ;;  %v1153_v47 = vmul.f32 %v1139_v13, %v1139_v13  ;;  %v2545_v0 = vld [vmem:[#allocation11 + $0x2] ss:$0 sm:$0xff] }
 0x68e   :  { %v1145_v16 = vadd.f32 %v1140_v15, %v1139_v13  ;;  %v1154_v17 = vmul.f32 %v1140_v15, %v1140_v15 }
 0x690   :  { %v1146_v19 = vrot.slane %v1145_v16, 4  ;;  %v1155_v9 = vadd.f32 %v1154_v17, %v1153_v47  ;;  %v1466_v47 = vstv %s2554_s14 }
 0x692   :  { %v1147_v20 = vadd.f32 %v1146_v19, %v1145_v16  ;;  %v1156_v21 = vrot.slane %v1155_v9, 4 }
 0x694   :  { %v1148_v22 = vrot.slane %v1147_v20, 2  ;;  %v1157_v23 = vadd.f32 %v1156_v21, %v1155_v9 }
 0x696   :  { %v1149_v7 = vadd.f32 %v1148_v22, %v1147_v20  ;;  %v1158_v24 = vrot.slane %v1157_v23, 2 }
 0x698   :  { %v1150_v25 = vrot.slane %v1149_v7, 1  ;;  %v1159_v26 = vadd.f32 %v1158_v24, %v1157_v23  ;;  %v3072_v24 = vld [vmem:[#allocation8 + $0x184] ss:$8 sps:$4 sm:$0xff]  }
 0x699   :  { %1754 = vmatprep.subr.bf16.mxu1 %v3072_v24 }
 0x69a   :  { %v1151_v27 = vadd.f32 %v1150_v25, %v1149_v7  ;;  %v1160_v12 = vrot.slane %v1159_v26, 1  ;;  %v3070_v25 = vld [vmem:[#allocation8 + $0x180] ss:$8 sps:$4 sm:$0xff]  }
 0x69c   :  { %v1152_v28 = vmul.f32 0.0625, %v1151_v27  ;;  %v1161_v29 = vadd.f32 %v1160_v12, %v1159_v26  ;;  %v3075_v26 = vld [vmem:[#allocation8 + $0x194] ss:$8 sps:$4 sm:$0xff]   ;;  %v3073_v27 = vld [vmem:[#allocation8 + $0x190] ss:$8 sps:$4 sm:$0xff]  }
 0x69d   :  { %v3078_v12 = vld [vmem:[#allocation8 + $0x1a4] ss:$8 sps:$4 sm:$0xff]  }
 0x69e   :  { %v1162_v14 = vmul.f32 0.0625, %v1161_v29  ;;  %v1163_v30 = vmul.f32 %v1152_v28, %v1152_v28  ;;  %v3081_v29 = vld [vmem:[#allocation8 + $0x1b4] ss:$8 sps:$4 sm:$0xff]  }
 0x6a0   :  { %v1164_v31 = vsub.f32 %v1162_v14, %v1163_v30  ;;  %v3079_v14 = vld [vmem:[#allocation8 + $0x1b0] ss:$8 sps:$4 sm:$0xff]   ;;  %v3084_v30 = vld [vmem:[#allocation8 + $0x1c4] ss:$8 sps:$4 sm:$0xff]  }
 0x6a2   :  { %v1165_v32 = vadd.f32 1e-05, %v1164_v31  ;;  %v3082_v31 = vld [vmem:[#allocation8 + $0x1c0] ss:$8 sps:$4 sm:$0xff]  }
 0x6a4   :  { %3130 = vrsqrt.f32 %v1165_v32  ;;  %v3087_v32 = vld [vmem:[#allocation8 + $0x1d4] ss:$8 sps:$4 sm:$0xff]  }
 0x6ae   :  { %v3131_v18 = vpop.eup %3130 }
 0x6af   :  { %v1167_v34 = vmul.f32 %v3131_v18, %v2526_v33  ;;  %v3085_v33 = vld [vmem:[#allocation8 + $0x1d0] ss:$8 sps:$4 sm:$0xff]   ;;  %v3090_v18 = vld [vmem:[#allocation8 + $0x1e4] ss:$8 sps:$4 sm:$0xff]  }
 0x6b1   :  { %v1174_v36 = vrot.slane %v1167_v34, %v3793_v50  ;;  %v1168_v37 = vmul.f32 %v1167_v34, %v1152_v28  ;;  %v3076_v28 = vld [vmem:[#allocation8 + $0x1a0] ss:$8 sps:$4 sm:$0xff]  }
 0x6b2   :  { %v3088_v34 = vld [vmem:[#allocation8 + $0x1e0] ss:$8 sps:$4 sm:$0xff]  }
 0x6b3   :  { %v1177_v38 = vmul.f32 %v1174_v36, %v1140_v15  ;;  %v1169_v39 = vsub.f32 %v1144_v35, %v1168_v37  ;;  %v1176_v40 = vmul.f32 %v1174_v36, %v1139_v13  ;;  %v3069_v13 = vld [vmem:[#allocation12 + $0xb8] sm:$0xff]   ;;  %v3091_v36 = vld [vmem:[#allocation8 + $0x1f0] ss:$8 sps:$4 sm:$0xff]  }
 0x6b4   :  { %v3093_v35 = vld [vmem:[#allocation8 + $0x1f4] ss:$8 sps:$4 sm:$0xff]   ;;  %v3094_v37 = vld [vmem:[#allocation9 + $0xc0] sm:$0xff]  }
 0x6b5   :  { %v1182_v41 = vrot.slane %v1169_v39, %v3793_v50  ;;  %v3096_v39 = vld [vmem:[#allocation9 + $0xd0] sm:$0xff]  }
 0x6b7   :  { %v1184_v42 = vadd.f32 %v1182_v41, %v1176_v40  ;;  %v1185_v43 = vadd.f32 %v1182_v41, %v1177_v38  ;;  %v3095_v38 = vld [vmem:[#allocation9 + $0xc8] sm:$0xff]   ;;  %v3097_v40 = vld [vmem:[#allocation9 + $0xd8] sm:$0xff]   ;;  %v3098_v41 = vld [vmem:[#allocation9 + $0xe0] sm:$0xff]  }
 0x6b9   :  { %v1203_v44 = vpack.c.bf16 %v1185_v43, %v1184_v42  ;;  %v3099_v42 = vld [vmem:[#allocation9 + $0xe8] sm:$0xff]   ;;  %v2555_v43 = vld [vmem:[#allocation14 + $0x2] ss:$0 sm:$0xff] }
 0x6bb   :  { %1330 = vmatmul.mubr.bf16.vlgmr.msra.gmra.mrb[12].mxu0 %v1203_v44  ;;  %v1214_v44 = vrot.slane %v3898_v55, %v3834_v62 }
 0x6bc   :  { %2832 = vmatprep.mubr.msk.bf16.mxu0 %vm3479_vm0, %v3478_v3  ;;  %2817 = vmatpush3.bf16.msra.mxu0 %v3062_v48 }
 0x6bd   :  { %2818 = vmatprep.subr.bf16.mxu0 %v3478_v3 }
 0x6c0   :  { %2819 = vmatpush3.bf16.msra.mxu0 %v3063_v49 }
 0x6c1   :  { %2820 = vmatprep.subr.bf16.mxu0 %v3478_v3 }
 0x6c4   :  { %2821 = vmatpush3.bf16.msra.mxu0 %v3064_v51 }
 0x6c5   :  { %2822 = vmatprep.subr.bf16.mxu0 %v3478_v3 }
 0x6c8   :  { %2823 = vmatpush3.bf16.msra.mxu0 %v3065_v52 }
 0x6c9   :  { %2824 = vmatprep.subr.bf16.mxu0 %v3478_v3 }
 0x6cc   :  { %2825 = vmatpush3.bf16.msra.mxu0 %v3066_v53 }
 0x6cd   :  { %2826 = vmatprep.subr.bf16.mxu0 %v3478_v3 }
 0x6d0   :  { %2827 = vmatpush3.bf16.msra.mxu0 %v3067_v54 }
 0x6d1   :  { %2828 = vmatprep.subr.bf16.mxu0 %v3478_v3 }
 0x6d4   :  { %2829 = vmatpush3.bf16.msra.mxu0 %v3068_v11 }
 0x6d5   :  { %2830 = vmatprep.subr.bf16.mxu0 %v3478_v3 }
 0x6d8   :  { %2831 = vmatpush3.bf16.msra.mxu0 %v3069_v13 }
 0x6d9   :  { %2836 = vmatprep.subr.bf16.mxu0 %v3478_v3 }
 0x78e   :  { %v1331_v57 = vpop.f32.mrb[12].mxu0 }
 0x78f   :  { %v1332_v59 = vadd.f32 %v1331_v57, %v1210_v56  ;;  %v3902_v60 = vpop.f32.mrb[13].mxu0 }
 0x790   :  { %v1335_v61 = vpop.f32.mrb[14].mxu0 }
 0x791   :  { %v1344_v63 = vmul.f32 %v1343_v58, %v1332_v59  ;;  %v1336_v1 = vadd.f32 %v1335_v61, %v1210_v56  ;;  %v3904_v4 = vpop.f32.mrb[15].mxu0  ;;  %vm1341_vm13 = vcmp.ge.f32.partialorder %v1332_v59, 0.0  ;;  %v1334_v56 = vadd.f32 %v3902_v60, %v1214_v44 }
 0x793   :  { %vm1342_vm14 = vcmp.ge.f32.partialorder %v1336_v1, 0.0  ;;  %v1345_v5 = vmul.f32 %v1343_v58, %v1336_v1  ;;  %v1346_v6 = vsel %vm1341_vm13, %v1332_v59, %v1344_v63  ;;  %v1338_v59 = vadd.f32 %v3904_v4, %v1214_v44 }
 0x794   :  { %vm2107_vm13 = vcmask 1040384  }
 0x795   :  { %v1347_v8 = vsel %vm1342_vm14, %v1336_v1, %v1345_v5  ;;  %vm2111_vm14 = vcmask 1041408  }
 0x796   :  { %v1365_v10 = vpack.c.bf16 %v1347_v8, %v1346_v6 }
 0x798   :  { %2813 = vmatmul.mubr.bf16.vlgmr.msra.gmra.mrb[12].mxu1 %v1365_v10 }
 0x799   :  { %1786 = vmatprep.mubr.bf16.mxu1 %v3477_v2  ;;  %1755 = vmatpush1.bf16.msra.mxu1 %v3070_v25  ;;  %v2565_v25 = vld [vmem:[%s4072_s19 + $0x3] sm:$0x1] }
 0x79a   :  { %1756 = vmatprep.subr.bf16.mxu1 %v3075_v26 }
 0x79d   :  { %1757 = vmatpush1.bf16.msra.mxu1 %v3073_v27 }
 0x79e   :  { %1758 = vmatprep.subr.bf16.mxu1 %v3078_v12  ;;  %v1601_v12 = vld [vmem:[#allocation6 + $0x3] sm:$0x1] }
 0x7a1   :  { %1759 = vmatpush1.bf16.msra.mxu1 %v3076_v28 }
 0x7a2   :  { %1760 = vmatprep.subr.bf16.mxu1 %v3081_v29 }
 0x7a5   :  { %1761 = vmatpush1.bf16.msra.mxu1 %v3079_v14 }
 0x7a6   :  { %1762 = vmatprep.subr.bf16.mxu1 %v3084_v30 }
 0x7a9   :  { %1763 = vmatpush1.bf16.msra.mxu1 %v3082_v31 }
 0x7aa   :  { %1764 = vmatprep.subr.bf16.mxu1 %v3087_v32 }
 0x7ad   :  { %1765 = vmatpush1.bf16.msra.mxu1 %v3085_v33 }
 0x7ae   :  { %1766 = vmatprep.subr.bf16.mxu1 %v3090_v18 }
 0x7b1   :  { %1767 = vmatpush1.bf16.msra.mxu1 %v3088_v34 }
 0x7b2   :  { %1768 = vmatprep.subr.bf16.mxu1 %v3093_v35  ;;  %v3100_v35 = vld [vmem:[#allocation9 + $0xf0] sm:$0xff]  }
 0x7b5   :  { %1769 = vmatpush1.bf16.msra.mxu1 %v3091_v36  ;;  %v3101_v36 = vld [vmem:[#allocation9 + $0xf8] sm:$0xff]  }
 0x7b6   :  { %2856 = vmatprep.subr.bf16.mxu1 %v3478_v3 }
 0x86b   :  { %v1456_v15 = vpop.f32.mrb[12].mxu1 }
 0x86c   :  { %v1457_v16 = vadd.f32 %v2545_v0, %v1456_v15  ;;  %v2814_v17 = vpop.f32.mrb[13].mxu1 }
 0x86d   :  { %v1459_v19 = vpop.f32.mrb[14].mxu1 }
 0x86e   :  { %v1467_v9 = vmul.f32 %v1466_v47, %v1457_v16  ;;  %v1460_v20 = vadd.f32 %v2545_v0, %v1459_v19  ;;  %v2815_v21 = vpop.f32.mrb[15].mxu1  ;;  %vm1464_vm15 = vcmp.ge.f32.partialorder %v1457_v16, 0.0 }
 0x870   :  { %vm1465_vm1 = vcmp.ge.f32.partialorder %v1460_v20, 0.0  ;;  %v1468_v2 = vmul.f32 %v1466_v47, %v1460_v20  ;;  %v1469_v22 = vsel %vm1464_vm15, %v1457_v16, %v1467_v9 }
 0x872   :  { %v1470_v23 = vsel %vm1465_vm1, %v1460_v20, %v1468_v2 }
 0x873   :  { %v1488_v7 = vpack.c.bf16 %v1470_v23, %v1469_v22 }
 0x875   :  { %2833 = vmatmul.mubr.bf16.vlgmr.msra.gmra.mrb[16].mxu0 %v1488_v7 }
 0x876   :  { %2852 = vmatprep.mubr.msk.bf16.mxu0 %vm3479_vm0, %v3478_v3  ;;  %2837 = vmatpush3.bf16.msra.mxu0 %v3094_v37  ;;  %v3102_v37 = vld [vmem:[#allocation12 + $0xc0] sm:$0xff]  }
 0x877   :  { %2838 = vmatprep.subr.bf16.mxu0 %v3478_v3 }
 0x87a   :  { %2839 = vmatpush3.bf16.msra.mxu0 %v3095_v38  ;;  %v3103_v38 = vld [vmem:[#allocation12 + $0xc8] sm:$0xff]  }
 0x87b   :  { %2840 = vmatprep.subr.bf16.mxu0 %v3478_v3 }
 0x87e   :  { %2841 = vmatpush3.bf16.msra.mxu0 %v3096_v39  ;;  %v3104_v39 = vld [vmem:[#allocation12 + $0xd0] sm:$0xff]  }
 0x87f   :  { %2842 = vmatprep.subr.bf16.mxu0 %v3478_v3 }
 0x882   :  { %2843 = vmatpush3.bf16.msra.mxu0 %v3097_v40  ;;  %v3105_v40 = vld [vmem:[#allocation12 + $0xd8] sm:$0xff]  }
 0x883   :  { %2844 = vmatprep.subr.bf16.mxu0 %v3478_v3 }
 0x886   :  { %2845 = vmatpush3.bf16.msra.mxu0 %v3098_v41  ;;  %v3106_v41 = vld [vmem:[#allocation12 + $0xe0] sm:$0xff]  }
 0x887   :  { %2846 = vmatprep.subr.bf16.mxu0 %v3478_v3 }
 0x88a   :  { %2847 = vmatpush3.bf16.msra.mxu0 %v3099_v42  ;;  %v3107_v42 = vld [vmem:[#allocation12 + $0xe8] sm:$0xff]  }
 0x88b   :  { %2848 = vmatprep.subr.bf16.mxu0 %v3478_v3 }
 0x88e   :  { %2849 = vmatpush3.bf16.msra.mxu0 %v3100_v35 }
 0x88f   :  { %2850 = vmatprep.subr.bf16.mxu0 %v3478_v3 }
 0x892   :  { %2851 = vmatpush3.bf16.msra.mxu0 %v3101_v36 }
 0x893   :  { %2876 = vmatprep.subr.bf16.mxu0 %v3478_v3 }
 0x948   :  { %v1579_v45 = vpop.f32.mrb[16].mxu0 }
 0x949   :  { %v1580_v48 = vadd.f32 %v2555_v43, %v1579_v45  ;;  %v2834_v49 = vpop.f32.mrb[17].mxu0 }
 0x94a   :  { %v1582_v51 = vpop.f32.mrb[18].mxu0 }
 0x94b   :  { %vm1587_vm2 = vcmp.ge.f32.partialorder %v1580_v48, 0.0  ;;  %v1590_v52 = vmul.f32 %v1589_v46, %v1580_v48  ;;  %v1583_v53 = vadd.f32 %v2555_v43, %v1582_v51  ;;  %v2835_v54 = vpop.f32.mrb[19].mxu0  ;;  %v3940_v43 = vld [vmem:[%s4039_s5 + $0x6] sm:$0x3] }
 0x94c   :  { %v1667_v44 = vrot.slane %v3940_v43, %v3793_v50 }
 0x94d   :  { %v1592_v57 = vsel %vm1587_vm2, %v1580_v48, %v1590_v52  ;;  %vm1588_vm3 = vcmp.ge.f32.partialorder %v1583_v53, 0.0  ;;  %v1591_v58 = vmul.f32 %v1589_v46, %v1583_v53  ;;  %v1800_v46 = vstv %s2583_s11 }
 0x94e   :  { %v1594_v61 = vadd.f32 %v1592_v57, %v1334_v56 }
 0x94f   :  { %v1593_v63 = vsel %vm1588_vm3, %v1583_v53, %v1591_v58 }
 0x950   :  { %v1596_v1 = vmax.f32 %v1594_v61, 0.0  ;;  %v1595_v55 = vadd.f32 %v1593_v63, %v1338_v59  ;;  %v3108_v61 = vld [vmem:[#allocation12 + $0xf0] sm:$0xff]   ;;  %v3109_v63 = vld [vmem:[#allocation12 + $0xf8] sm:$0xff]  }
 0x952   :  { %v1597_v5 = vmax.f32 %v1595_v55, 0.0  ;;  %v1610_v6 = vmul.f32 %v1596_v1, %v1596_v1  ;;  %v2056_v55 = vld [vmem:[%s4073_s18 + $0x8] sm:$0xff] }
 0x953   :  { %vm2058_vm7 = vcmp.eq.s32.totalorder %v2056_v55, 0  ;;  %vm2083_vm9 = vcmp.eq.s32.totalorder %v2056_v55, 1 }
 0x954   :  { %v1602_v8 = vadd.f32 %v1597_v5, %v1596_v1  ;;  %v1611_v10 = vmul.f32 %v1597_v5, %v1597_v5 }
 0x956   :  { %v1603_v11 = vrot.slane %v1602_v8, 4  ;;  %v1612_v13 = vadd.f32 %v1611_v10, %v1610_v6  ;;  %v2605_v6 = vsel %vm2058_vm7, 1.0, %v3478_v3  ;;  %v2607_v10 = vsel %vm2083_vm9, 1.0, %v3478_v3 }
 0x958   :  { %v1604_v0 = vadd.f32 %v1603_v11, %v1602_v8  ;;  %v1613_v15 = vrot.slane %v1612_v13, 4 }
 0x95a   :  { %v1605_v47 = vrot.slane %v1604_v0, 2  ;;  %v1614_v16 = vadd.f32 %v1613_v15, %v1612_v13 }
 0x95c   :  { %v1606_v60 = vadd.f32 %v1605_v47, %v1604_v0  ;;  %v1615_v17 = vrot.slane %v1614_v16, 2  ;;  %v2584_v0 = vld [vmem:[#allocation11 + $0x3] ss:$0 sm:$0xff]  ;;  %v1923_v47 = vstv %s2593_s25 }
 0x95e   :  { %v1607_v19 = vrot.slane %v1606_v60, 1  ;;  %v1616_v9 = vadd.f32 %v1615_v17, %v1614_v16 }
 0x960   :  { %v1608_v20 = vadd.f32 %v1607_v19, %v1606_v60  ;;  %v1617_v4 = vrot.slane %v1616_v9, 1 }
 0x962   :  { %v1609_v21 = vmul.f32 0.0625, %v1608_v20  ;;  %v1618_v2 = vadd.f32 %v1617_v4, %v1616_v9 }
 0x964   :  { %v1619_v22 = vmul.f32 0.0625, %v1618_v2  ;;  %v1620_v23 = vmul.f32 %v1609_v21, %v1609_v21 }
 0x966   :  { %v1621_v7 = vsub.f32 %v1619_v22, %v1620_v23  ;;  %v3110_v23 = vld [vmem:[#allocation17] sm:$0xff]  }
 0x968   :  { %v1622_v24 = vadd.f32 1e-05, %v1621_v7  ;;  %v3111_v7 = vld [vmem:[#allocation17 + $0x8] sm:$0xff]  }
 0x96a   :  { %3132 = vrsqrt.f32 %v1622_v24  ;;  %v3112_v24 = vld [vmem:[#allocation17 + $0x10] sm:$0xff]  }
 0x974   :  { %v3133_v26 = vpop.eup %3132 }
 0x975   :  { %v1624_v27 = vmul.f32 %v3133_v26, %v2565_v25  ;;  %v3113_v25 = vld [vmem:[#allocation17 + $0x18] sm:$0xff]   ;;  %v3114_v26 = vld [vmem:[#allocation17 + $0x20] sm:$0xff]  }
 0x977   :  { %v1631_v28 = vrot.slane %v1624_v27, %v3793_v50  ;;  %v1625_v29 = vmul.f32 %v1624_v27, %v1609_v21  ;;  %v3115_v27 = vld [vmem:[#allocation17 + $0x28] sm:$0xff]  }
 0x979   :  { %v1634_v14 = vmul.f32 %v1631_v28, %v1597_v5  ;;  %v1626_v30 = vsub.f32 %v1601_v12, %v1625_v29  ;;  %v1633_v31 = vmul.f32 %v1631_v28, %v1596_v1  ;;  %v2055_v1 = vld [vmem:[%s4073_s18] sm:$0xff]  ;;  %v3116_v12 = vld [vmem:[#allocation17 + $0x30] sm:$0xff]   ;;  %v3117_v28 = vld [vmem:[#allocation17 + $0x38] sm:$0xff]  }
 0x97a   :  { %vm2057_vm6 = vcmp.eq.s32.totalorder %v2055_v1, 0  ;;  %vm2082_vm8 = vcmp.eq.s32.totalorder %v2055_v1, 1  ;;  %v2594_v29 = vld [vmem:[#allocation14 + $0x3] ss:$0 sm:$0xff] }
 0x97b   :  { %v1639_v32 = vrot.slane %v1626_v30, %v3793_v50  ;;  %v2604_v5 = vsel %vm2057_vm6, 1.0, %v3478_v3  ;;  %v2606_v8 = vsel %vm2082_vm8, 1.0, %v3478_v3 }
 0x97c   :  { %v2940_v11 = vpack.i.bf16 %v2605_v6, %v2604_v5  ;;  %v2945_v13 = vpack.i.bf16 %v2607_v10, %v2606_v8 }
 0x97d   :  { %v1641_v33 = vadd.f32 %v1639_v32, %v1633_v31  ;;  %v1642_v18 = vadd.f32 %v1639_v32, %v1634_v14  ;;  %v1671_v14 = vrot.slane %v3940_v43, %v3834_v62  ;;  %v2046_v31 = vstv %s2603_s21 }
 0x97e   :  { %2941 = vperm.xlu0 %2939, %v2940_v11  }
 0x97f   :  { %v1660_v34 = vpack.c.bf16 %v1642_v18, %v1641_v33 }
 0x981   :  { %1787 = vmatmul.mubr.bf16.vlgmr.msra.gmra.mrb[16].mxu1 %v1660_v34 }
 0x982   :  { %2872 = vmatprep.mubr.msk.bf16.mxu1 %vm3479_vm0, %v3478_v3  ;;  %2857 = vmatpush3.bf16.msra.mxu1 %v3102_v37 }
 0x983   :  { %2858 = vmatprep.subr.bf16.mxu1 %v3478_v3  ;;  %2946 = vperm.xlu0 %2939, %v2945_v13  }
 0x986   :  { %2859 = vmatpush3.bf16.msra.mxu1 %v3103_v38 }
 0x987   :  { %2860 = vmatprep.subr.bf16.mxu1 %v3478_v3 }
 0x98a   :  { %2861 = vmatpush3.bf16.msra.mxu1 %v3104_v39 }
 0x98b   :  { %2862 = vmatprep.subr.bf16.mxu1 %v3478_v3 }
 0x98e   :  { %2863 = vmatpush3.bf16.msra.mxu1 %v3105_v40 }
 0x98f   :  { %2864 = vmatprep.subr.bf16.mxu1 %v3478_v3 }
 0x992   :  { %2865 = vmatpush3.bf16.msra.mxu1 %v3106_v41 }
 0x993   :  { %2866 = vmatprep.subr.bf16.mxu1 %v3478_v3 }
 0x996   :  { %2867 = vmatpush3.bf16.msra.mxu1 %v3107_v42 }
 0x997   :  { %2868 = vmatprep.subr.bf16.mxu1 %v3478_v3 }
 0x99a   :  { %2869 = vmatpush3.bf16.msra.mxu1 %v3108_v61 }
 0x99b   :  { %2870 = vmatprep.subr.bf16.mxu1 %v3478_v3 }
 0x99e   :  { %2871 = vmatpush3.bf16.msra.mxu1 %v3109_v63 }
 0x99f   :  { %2896 = vmatprep.subr.bf16.mxu1 %v3478_v3 }
 0x9fd   :  { %v2942_v33 = vpop.permute.xlu0 %2941 }
 0xa02   :  { %v2947_v62 = vpop.permute.xlu0 %2946 }
 0xa54   :  { %v1788_v45 = vpop.f32.mrb[16].mxu1 }
 0xa55   :  { %v1789_v48 = vadd.f32 %v1788_v45, %v1667_v44  ;;  %v3944_v49 = vpop.f32.mrb[17].mxu1 }
 0xa56   :  { %v1792_v51 = vpop.f32.mrb[18].mxu1  ;;  %v1791_v38 = vadd.f32 %v3944_v49, %v1671_v14 }
 0xa57   :  { %v1801_v52 = vmul.f32 %v1800_v46, %v1789_v48  ;;  %v1793_v53 = vadd.f32 %v1792_v51, %v1667_v44  ;;  %v3946_v54 = vpop.f32.mrb[19].mxu1  ;;  %vm1798_vm4 = vcmp.ge.f32.partialorder %v1789_v48, 0.0  ;;  %v2949_v51 = vunpack.i.h.bf16 %v2947_v62 }
 0xa58   :  { %v1795_v41 = vadd.f32 %v3946_v54, %v1671_v14 }
 0xa59   :  { %vm1799_vm5 = vcmp.ge.f32.partialorder %v1793_v53, 0.0  ;;  %v1802_v56 = vmul.f32 %v1800_v46, %v1793_v53  ;;  %v1803_v57 = vsel %vm1798_vm4, %v1789_v48, %v1801_v52  ;;  %v2944_v46 = vunpack.i.h.bf16 %v2942_v33 }
 0xa5a   :  { %v2943_v48 = vunpack.i.l.bf16 %v2942_v33  ;;  %v2948_v52 = vunpack.i.l.bf16 %v2947_v62  ;;  %v2110_v33 = vld [vmem:[#allocation15] sm:$0x1]  ;;  %v3122_v62 = vld [vmem:[%s4050_s16 + $0x20] sm:$0xff]  }
 0xa5b   :  { %v1804_v58 = vsel %vm1799_vm5, %v1793_v53, %v1802_v56 }
 0xa5c   :  { %v1822_v59 = vpack.c.bf16 %v1804_v58, %v1803_v57 }
 0xa5e   :  { %2853 = vmatmul.mubr.bf16.vlgmr.msra.gmra.mrb[20].mxu0 %v1822_v59 }
 0xa5f   :  { %2892 = vmatprep.mubr.msk.bf16.mxu0 %vm3479_vm0, %v3478_v3  ;;  %2877 = vmatpush3.bf16.msra.mxu0 %v3110_v23 }
 0xa60   :  { %2878 = vmatprep.subr.bf16.mxu0 %v3478_v3 }
 0xa63   :  { %2879 = vmatpush3.bf16.msra.mxu0 %v3111_v7 }
 0xa64   :  { %2880 = vmatprep.subr.bf16.mxu0 %v3478_v3 }
 0xa67   :  { %2881 = vmatpush3.bf16.msra.mxu0 %v3112_v24 }
 0xa68   :  { %2882 = vmatprep.subr.bf16.mxu0 %v3478_v3 }
 0xa6b   :  { %2883 = vmatpush3.bf16.msra.mxu0 %v3113_v25 }
 0xa6c   :  { %2884 = vmatprep.subr.bf16.mxu0 %v3478_v3 }
 0xa6f   :  { %2885 = vmatpush3.bf16.msra.mxu0 %v3114_v26 }
 0xa70   :  { %2886 = vmatprep.subr.bf16.mxu0 %v3478_v3 }
 0xa73   :  { %2887 = vmatpush3.bf16.msra.mxu0 %v3115_v27 }
 0xa74   :  { %2888 = vmatprep.subr.bf16.mxu0 %v3478_v3 }
 0xa77   :  { %2889 = vmatpush3.bf16.msra.mxu0 %v3116_v12 }
 0xa78   :  { %2890 = vmatprep.subr.bf16.mxu0 %v3478_v3 }
 0xa7b   :  { %2891 = vmatpush3.bf16.msra.mxu0 %v3117_v28 }
 0xb31   :  { %v1913_v15 = vpop.f32.mrb[20].mxu0 }
 0xb32   :  { %v1914_v16 = vadd.f32 %v2584_v0, %v1913_v15  ;;  %v2854_v60 = vpop.f32.mrb[21].mxu0 }
 0xb33   :  { %v1916_v17 = vpop.f32.mrb[22].mxu0 }
 0xb34   :  { %v1924_v19 = vmul.f32 %v1923_v47, %v1914_v16  ;;  %v1917_v9 = vadd.f32 %v2584_v0, %v1916_v17  ;;  %v2855_v20 = vpop.f32.mrb[23].mxu0  ;;  %vm1921_vm10 = vcmp.ge.f32.partialorder %v1914_v16, 0.0 }
 0xb36   :  { %vm1922_vm11 = vcmp.ge.f32.partialorder %v1917_v9, 0.0  ;;  %v1925_v4 = vmul.f32 %v1923_v47, %v1917_v9  ;;  %v1926_v21 = vsel %vm1921_vm10, %v1914_v16, %v1924_v19 }
 0xb38   :  { %v1927_v2 = vsel %vm1922_vm11, %v1917_v9, %v1925_v4 }
 0xb39   :  { %v1945_v22 = vpack.c.bf16 %v1927_v2, %v1926_v21 }
 0xb3b   :  { %2873 = vmatmul.mubr.bf16.vlgmr.msra.gmra.mrb[20].mxu1 %v1945_v22 }
 0xb3c   :  { %2912 = vmatprep.mubr.msk.bf16.mxu1 %vm3479_vm0, %v3478_v3 }
 0xc0e   :  { %v2036_v30 = vpop.f32.mrb[20].mxu1 }
 0xc0f   :  { %v2037_v32 = vadd.f32 %v2594_v29, %v2036_v30  ;;  %v2874_v18 = vpop.f32.mrb[21].mxu1  ;;  %v2109_v30 = vld [vmem:[%s4044_s10] sm:$0x1] }
 0xc10   :  { %v2039_v34 = vpop.f32.mrb[22].mxu1 }
 0xc11   :  { %vm2044_vm0 = vcmp.ge.f32.partialorder %v2037_v32, 0.0  ;;  %v2047_v35 = vmul.f32 %v2046_v31, %v2037_v32  ;;  %v2040_v36 = vadd.f32 %v2594_v29, %v2039_v34  ;;  %v2875_v37 = vpop.f32.mrb[23].mxu1 }
 0xc13   :  { %v2049_v39 = vsel %vm2044_vm0, %v2037_v32, %v2047_v35  ;;  %vm2045_vm12 = vcmp.ge.f32.partialorder %v2040_v36, 0.0  ;;  %v2048_v40 = vmul.f32 %v2046_v31, %v2040_v36 }
 0xc14   :  { %v2051_v42 = vadd.f32 %v2049_v39, %v1791_v38 }
 0xc15   :  { %v2050_v44 = vsel %vm2045_vm12, %v2040_v36, %v2048_v40  ;;  %v3118_v40 = vld [vmem:[%s4050_s16] sm:$0xff]  }
 0xc16   :  { %v2053_v43 = vmax.f32 %v2051_v42, 0.0  ;;  %v2052_v45 = vadd.f32 %v2050_v44, %v1795_v41  ;;  %2897 = vmatpush3.bf16.msra.mxu1 %v3118_v40  ;;  %v3119_v41 = vld [vmem:[%s4050_s16 + $0x8] sm:$0xff]   ;;  %v3120_v42 = vld [vmem:[%s4050_s16 + $0x10] sm:$0xff]   ;;  %v3121_v44 = vld [vmem:[%s4050_s16 + $0x18] sm:$0xff]  }
 0xc17   :  { %2898 = vmatprep.subr.bf16.mxu1 %v3478_v3 }
 0xc18   :  { %v2054_v53 = vmax.f32 %v2052_v45, 0.0  ;;  %v2073_v56 = vmul.f32 %v2943_v48, %v2053_v43  ;;  %v2098_v58 = vmul.f32 %v2948_v52, %v2053_v43  ;;  %v3123_v43 = vld [vmem:[%s4050_s16 + $0x28] sm:$0xff]   ;;  %v3124_v45 = vld [vmem:[%s4050_s16 + $0x30] sm:$0xff]   ;;  %v2608_v48 = vld [vmem:[#allocation18] ss:$0 sm:$0xff] }
 0xc1a   :  { %v2074_v57 = vmul.f32 %v2944_v46, %v2054_v53  ;;  %v2099_v59 = vmul.f32 %v2949_v51, %v2054_v53  ;;  %2899 = vmatpush3.bf16.msra.mxu1 %v3119_v41  ;;  %v3125_v46 = vld [vmem:[%s4050_s16 + $0x38] sm:$0xff]  }
 0xc1b   :  { %2900 = vmatprep.subr.bf16.mxu1 %v3478_v3 }
 0xc1c   :  { %v2075_v49 = vadd.f32 %v2074_v57, %v2073_v56  ;;  %v2100_v61 = vadd.f32 %v2099_v59, %v2098_v58 }
 0xc1e   :  { %v2076_v63 = vrot.slane %v2075_v49, 4  ;;  %v2101_v1 = vrot.slane %v2100_v61, 4  ;;  %2901 = vmatpush3.bf16.msra.mxu1 %v3120_v42 }
 0xc1f   :  { %2902 = vmatprep.subr.bf16.mxu1 %v3478_v3 }
 0xc20   :  { %v2077_v55 = vadd.f32 %v2076_v63, %v2075_v49  ;;  %v2102_v54 = vadd.f32 %v2101_v1, %v2100_v61 }
 0xc22   :  { %v2078_v5 = vrot.slane %v2077_v55, 2  ;;  %v2103_v6 = vrot.slane %v2102_v54, 2  ;;  %2903 = vmatpush3.bf16.msra.mxu1 %v3121_v44 }
 0xc23   :  { %2904 = vmatprep.subr.bf16.mxu1 %v3478_v3 }
 0xc24   :  { %v2079_v8 = vadd.f32 %v2078_v5, %v2077_v55  ;;  %v2104_v10 = vadd.f32 %v2103_v6, %v2102_v54 }
 0xc26   :  { %v2080_v11 = vrot.slane %v2079_v8, 1  ;;  %v2105_v13 = vrot.slane %v2104_v10, 1  ;;  %2905 = vmatpush3.bf16.msra.mxu1 %v3122_v62 }
 0xc27   :  { %2906 = vmatprep.subr.bf16.mxu1 %v3478_v3 }
 0xc28   :  { %v2081_v0 = vadd.f32 %v2080_v11, %v2079_v8  ;;  %v2106_v15 = vadd.f32 %v2105_v13, %v2104_v10 }
 0xc2a   :  { %v2108_v47 = vsel %vm2107_vm13, %v2081_v0, %v2106_v15  ;;  %2907 = vmatpush3.bf16.msra.mxu1 %v3123_v43 }
 0xc2b   :  { %v2112_v16 = vsel %vm2111_vm14, %v2108_v47, 0.0  ;;  %v2121_v60 = vmul.f32 %v2108_v47, %v2108_v47  ;;  %2908 = vmatprep.subr.bf16.mxu1 %v3478_v3 }
 0xc2c   :  { %v2113_v17 = vrot.slane %v2112_v16, 4 }
 0xc2d   :  { %v2122_v19 = vsel %vm2111_vm14, %v2121_v60, 0.0 }
 0xc2e   :  { %v2114_v9 = vadd.f32 %v2113_v17, %v2112_v16  ;;  %v2123_v20 = vrot.slane %v2122_v19, 4  ;;  %2909 = vmatpush3.bf16.msra.mxu1 %v3124_v45 }
 0xc2f   :  { %2910 = vmatprep.subr.bf16.mxu1 %v3478_v3 }
 0xc30   :  { %v2115_v4 = vrot.slane %v2114_v9, 2  ;;  %v2124_v21 = vadd.f32 %v2123_v20, %v2122_v19  ;;  %v2264_v19 = vld [vmem:[#allocation20] sm:$0x1] }
 0xc32   :  { %v2116_v2 = vadd.f32 %v2115_v4, %v2114_v9  ;;  %v2125_v22 = vrot.slane %v2124_v21, 2  ;;  %2911 = vmatpush3.bf16.msra.mxu1 %v3125_v46  ;;  %v2265_v4 = vld [vmem:[#allocation21] sm:$0x1] }
 0xc34   :  { %v2117_v23 = vrot.slane %v2116_v2, 1  ;;  %v2126_v7 = vadd.f32 %v2125_v22, %v2124_v21 }
 0xc36   :  { %v2118_v24 = vadd.f32 %v2117_v23, %v2116_v2  ;;  %v2127_v25 = vrot.slane %v2126_v7, 1 }
 0xc38   :  { %v2120_v26 = vmul.f32 0.5, %v2118_v24  ;;  %v2128_v27 = vadd.f32 %v2127_v25, %v2126_v7 }
 0xc3a   :  { %v2129_v12 = vmul.f32 0.5, %v2128_v27  ;;  %v2130_v28 = vmul.f32 %v2120_v26, %v2120_v26 }
 0xc3c   :  { %v2131_v29 = vsub.f32 %v2129_v12, %v2130_v28 }
 0xc3e   :  { %v2132_v14 = vadd.f32 1e-05, %v2131_v29 }
 0xc40   :  { %3134 = vrsqrt.f32 %v2132_v14 }
 0xc4a   :  { %v3135_v31 = vpop.eup %3134 }
 0xc4b   :  { %v2134_v32 = vmul.f32 %v3135_v31, %v2109_v30 }
 0xc4d   :  { %v2135_v18 = vmul.f32 %v2134_v32, %v2120_v26  ;;  %v2141_v34 = vrot.slane %v2134_v32, %v3793_v50  ;;  %v2617_v26 = vld [vmem:[%s4051_s17] ss:$0 sm:$0xff]  ;;  %s3480_s17 = smov [#allocation24]  }
 0xc4e   :  { %s2435_s11 = sshll.u32 %s3480_s17, 4  ;;  %s2436_s11 = int_to_ptr.vmem [resolvable:$true] %s2435_s11 }
 0xc4f   :  { %v2136_v35 = vsub.f32 %v2110_v33, %v2135_v18  ;;  %v2143_v36 = vmul.f32 %v2141_v34, %v2108_v47  ;;  %s3418_s24 = scalar_lea.vmem %s2436_s11, 32  ;;  %p3423_p4 = scmp.lt.s32.totalorder %s2436_s11, %s2436_s11 }
 0xc50   :  { %p3419_p3 = scmp.ne.s32.totalorder %s2436_s11, %s3418_s24  ;;  %p3424_p5 = scmp.lt.s32.totalorder %s3418_s24, %s3418_s24 }
 0xc51   :  { %v2148_v37 = vrot.slane %v2136_v35, %v3793_v50 }
 0xc52   :  { %p3425_p6 = por %p3424_p5, %p3423_p4 }
 0xc53   :  { %v2150_v38 = vadd.f32 %v2148_v37, %v2143_v36 }
 0xc54   :  { %p3426_p7 = pnand %p3425_p6, %p3419_p3 }
 0xc55   :  { %v2167_v39 = vpack.c.bf16 %v2150_v38, %v2150_v38 }
 0xc57   :  { %2893 = vmatmul.mubr.bf16.vlgmr.msra.gmra.mrb[24].mxu0 %v2167_v39 }
 0xd2a   :  { %v2257_v51 = vpop.f32.mrb[24].mxu0 }
 0xd2b   :  { %v2258_v52 = vadd.f32 %v2608_v48, %v2257_v51  ;;  %v2894_v53 = vpop.f32.mrb[25].mxu0 }
 0xd2c   :  { %v2260_v56 = vpop.f32.mrb[26].mxu0 }
 0xd2d   :  { %v2263_v57 = vmax.f32 %v2258_v52, 0.0  ;;  %v2895_v58 = vpop.f32.mrb[27].mxu0 }
 0xd2f   :  { %v2266_v59 = vsel %vm2111_vm14, %v2263_v57, 0.0  ;;  %v2274_v49 = vmul.f32 %v2263_v57, %v2263_v57 }
 0xd30   :  { %v2267_v61 = vrot.slane %v2266_v59, 4 }
 0xd31   :  { %v2275_v63 = vsel %vm2111_vm14, %v2274_v49, 0.0 }
 0xd32   :  { %v2268_v1 = vadd.f32 %v2267_v61, %v2266_v59  ;;  %v2276_v3 = vrot.slane %v2275_v63, 4 }
 0xd34   :  { %v2269_v55 = vrot.slane %v2268_v1, 2  ;;  %v2277_v54 = vadd.f32 %v2276_v3, %v2275_v63 }
 0xd36   :  { %v2270_v5 = vadd.f32 %v2269_v55, %v2268_v1  ;;  %v2278_v6 = vrot.slane %v2277_v54, 2 }
 0xd38   :  { %v2271_v8 = vrot.slane %v2270_v5, 1  ;;  %v2279_v10 = vadd.f32 %v2278_v6, %v2277_v54 }
 0xd3a   :  { %v2272_v11 = vadd.f32 %v2271_v8, %v2270_v5  ;;  %v2280_v13 = vrot.slane %v2279_v10, 1 }
 0xd3c   :  { %v2273_v0 = vmul.f32 0.5, %v2272_v11  ;;  %v2281_v15 = vadd.f32 %v2280_v13, %v2279_v10 }
 0xd3e   :  { %v2282_v47 = vmul.f32 0.5, %v2281_v15  ;;  %v2283_v16 = vmul.f32 %v2273_v0, %v2273_v0 }
 0xd40   :  { %v2284_v60 = vsub.f32 %v2282_v47, %v2283_v16 }
 0xd42   :  { %v2285_v17 = vadd.f32 1e-05, %v2284_v60 }
 0xd44   :  { %3136 = vrsqrt.f32 %v2285_v17 }
 0xd4e   :  { %v3137_v9 = vpop.eup %3136 }
 0xd4f   :  { %v2287_v20 = vmul.f32 %v3137_v9, %v2264_v19 }
 0xd51   :  { %v2288_v21 = vmul.f32 %v2287_v20, %v2273_v0  ;;  %v2294_v2 = vrot.slane %v2287_v20, %v3793_v50 }
 0xd53   :  { %v2289_v22 = vsub.f32 %v2265_v4, %v2288_v21  ;;  %v2296_v23 = vmul.f32 %v2294_v2, %v2263_v57 }
 0xd55   :  { %v2301_v7 = vrot.slane %v2289_v22, %v3793_v50 }
 0xd57   :  { %v2303_v24 = vadd.f32 %v2301_v7, %v2296_v23 }
 0xd59   :  { %v2320_v25 = vpack.c.bf16 %v2303_v24, %v2303_v24 }
 0xd5b   :  { %2913 = vmatmul.mubr.bf16.vlgmr.msra.gmra.mrb[24].mxu1 %v2320_v25 }
 0xe2e   :  { %v2410_v27 = vpop.f32.mrb[24].mxu1 }
 0xe2f   :  { %v2411_v12 = vadd.f32 %v2617_v26, %v2410_v27  ;;  %v2914_v28 = vpop.f32.mrb[25].mxu1 }
 0xe30   :  { %v2413_v29 = vpop.f32.mrb[26].mxu1 }
 0xe31   :  { %v2915_v14 = vpop.f32.mrb[27].mxu1  ;;  %v2416_v30 = vsel %vm2111_vm14, %v2411_v12, -inf }
 0xe32   :  { %2417 = vmax.xlane.f32.xlu1 %v2416_v30 }
 0xebf   :  { %v2418_v31 = vpop.xlane.xlu1 %2417 }
 0xec0   :  { %v2419_v32 = vsub.f32 %v2411_v12, %v2418_v31 }
 0xec2   :  { %v2420_v33 = vmul.f32 1.442695, %v2419_v32 }
 0xec4   :  { %3138 = vpow2.f32 %v2420_v33 }
 0xece   :  { %v3139_v50 = vpop.eup %3138 }
 0xecf   :  { %v2422_v18 = vsel %vm2111_vm14, %v3139_v50, 0.0 }
 0xed0   :  { %2423 = vadd.xlane.f32.xlu1 %v2422_v18 }
 0xf5d   :  { %v2424_v34 = vpop.xlane.xlu1 %2423 }
 0xf5e   :  { %3140 = vlog2.f32 %v2424_v34 }
 0xf68   :  { %v3141_v35 = vpop.eup %3140 }
 0xf69   :  { %v2426_v36 = vmul.f32 0.6931472, %v3141_v35 }
 0xf6b   :  { %v2427_v37 = vsub.f32 %v2419_v32, %v2426_v36 }
 0xf6d   :  { %2428 = vst [vmem:[#allocation24] sm:$0x3] %v2427_v37 }
 0xf6e   :  { %3429 = shalt.err (!%p3426_p7)
}
 0xf6f   :  { %s4074_s15 = sld [smem:[#allocation38_spill]] }
 0xf75   :  { %s3430_s18 = scalar_lea.hbm %s4074_s15, 32 }
 0xf76   :  { %p3431_p8 = scmp.ne.s32.totalorder %s4074_s15, %s3430_s18  ;;  %p3434_p9 = scmp.lt.u32.totalorder %s3430_s18, %s4074_s15 }
 0xf78   :  { %p3436_p10 = pnand %p3434_p9, %p3431_p8 }
 0xf7a   :  { %3439 = shalt.err (!%p3436_p10)
}
 0xf7b   :  { %2438 = dma.vmem_to_hbm [thread:$0]  %s2436_s11, 32, %s4074_s15, [#allocation4]  }
 0xf7c   :  { %3456 = dma.done.wait [#allocation4], 32  }
 0xf7d   :  { %3457 = vsyncadd [#allocation4], 4294967264 }
 0xf7e   :  { %2442 = vsyncpa [#allocation3], 1 }
 0xf7f   :  { %2443 = vsyncpa [#allocation7], 1 }
 0xf80   :  { %2444 = vsyncpa [#allocation10], 1 }
 0xf81   :  { %2445 = vsyncpa [#allocation13], 1 }
 0xf82   :  { %2446 = vsyncpa [#allocation16], 1 }
 0xf83   :  { %2447 = vsyncpa [#allocation19], 1 }
 0xf84   :  { %2448 = vsyncpa [#allocation22], 1 }
 0xf85   :  { %2449 = vsyncpa [#allocation4], 1 }
 0xf86   :  { %2450 = vsyncpa [#allocation5], 1 }

</bundles_post_ra>
